<compile_context>
chip_gen: v5e
topology: v5e:2x2
jax: 0.10.0
libtpu: 0.0.40
codegen_flags: <defaults>
</compile_context>

<pallas_src>
import functools
import numpy as np
import jax
import jax.numpy as jnp
from jax.experimental import pallas as pl
from jax.experimental.pallas import tpu as pltpu

C = 32                       # node embedding dim ("32x0e")
NUM_HEADS = 4
HEAD_DIM = 8                 # "8x0e" per head
ALPHA_HEAD = 8               # scalar alpha channels per head
HD = NUM_HEADS * HEAD_DIM    # 32
HA = NUM_HEADS * ALPHA_HEAD  # 32
EDGE_SCALAR_DIM = 8
FC_HIDDEN = 16               # fc_neurons = [8, 16]
MLP_MID = 3 * C              # irreps_mlp_mid = 3 -> "96x0e"
PACK_W = 128                 # packed per-edge input width (lane-dense)
LANE_EATTR = 2 * C           # lanes 64:96 carry edge_attr broadcast to 32 lanes
LANE_ESCAL = 2 * C + HD      # lanes 96:104 carry the 8 edge scalars
LN_EPS = 1e-5
NEG_INF = -1e30
VMEM_LIMIT = 48 * 1024 * 1024       # above v5e/v6e/v7x scoped defaults, below physical
DST_SV_BUDGET = 16 * 1024 * 1024    # double-buffered score+value blocks budget


# ---------------------------------------------------------------- small helpers
def _cdiv(a, b):
    return -(-a // b)


def _round_up(x, m):
    return ((x + m - 1) // m) * m


def _silu(x):
    return x * jax.nn.sigmoid(x)


def _smooth_leaky_relu(x, alpha=0.2):
    return 0.5 * (1.0 + alpha) * x + 0.5 * (1.0 - alpha) * x * (2.0 * jax.nn.sigmoid(x) - 1.0)


def _layernorm(x, gamma, beta, eps=LN_EPS):
    mu = jnp.mean(x, axis=-1, keepdims=True)
    xc = x - mu
    var = jnp.mean(xc * xc, axis=-1, keepdims=True)
    return xc * jax.lax.rsqrt(var + eps) * gamma + beta


def _bf16_dot(a, b):
    # Explicit bf16 MXU operands (single-pass), f32 accumulation (v6e/v7x fast path;
    # pure bandwidth win on v5e).  Elementwise / EUP math stays f32.
    return jnp.dot(a.astype(jnp.bfloat16), b.astype(jnp.bfloat16),
                   preferred_element_type=jnp.float32)


def _const_spec(shape):
    return pl.BlockSpec(shape, lambda i, _n=len(shape): (0,) * _n)


# ---------------------------------------------------------------- kernel 1: per-edge work
# Fuses: message linear (src+dst) + RadialProfile fc1 (one block-structured matmul on
# the packed 128-lane input), RadialProfile LN/SiLU/fc2, depthwise TP, fused alpha+value
# projection, value DTP + linear, SmoothLeakyReLU, per-head score reduction (replicated
# to 32 lanes), and in-kernel sentinel masking for padded rows.
def _edge_kernel(xe_ref, wfused_ref, fc2w_ref, wav_ref, vlinw_ref, headrep_ref, cvec_ref,
                 s_ref, v_ref, *, e_total, tile_e):
    xe = xe_ref[...]                  # (T, 128) packed [src | dst | eattr*32 | escal | 0]
    cv = cvec_ref[...]                # (8, 128) packed vector constants

    # fused message linear + fc1:  [msg | h | 0] = packed @ W_fused + b_fused
    mh = _bf16_dot(xe, wfused_ref[...]) + cv[0:1, 0:2 * C]          # (T, 64)
    msg = mh[:, 0:C]                                                # (T, 32)
    h = mh[:, C:C + FC_HIDDEN]                                      # (T, 16)
    eattr = xe[:, LANE_EATTR:LANE_EATTR + C]                        # (T, 32) pre-broadcast

    # RadialProfile tail: LayerNorm + SiLU + fc2 -> depthwise-TP weights
    h = _silu(_layernorm(h, cv[1:2, 0:FC_HIDDEN], cv[2:3, 0:FC_HIDDEN]))
    w_dtp = _bf16_dot(h, fc2w_ref[...]) + cv[3:4, 0:C]              # (T, 32)
    msg_tp = msg * eattr * w_dtp                                    # depthwise TP (0e)

    # fused alpha + value projection: (T,32) @ (32,64)
    av = _bf16_dot(msg_tp, wav_ref[...]) + cv[4:5, 0:HA + C]        # (T, 64)
    alpha = _smooth_leaky_relu(av[:, 0:HA]) * cv[7:8, 0:HA]         # * alpha_dot
    val = _silu(av[:, HA:HA + C]) * eattr * cv[5:6, 0:C]            # SiLU gate * DTP
    value = _bf16_dot(val, vlinw_ref[...]) + cv[6:7, 0:HD]          # (T, 32)
    score = _bf16_dot(alpha, headrep_ref[...])                      # per-head sum, replicated

    # padded rows (>= E) become softmax sentinels: score=-1e30, value=0
    rows = jax.lax.broadcasted_iota(jnp.int32, (tile_e, 1), 0) + pl.program_id(0) * tile_e
    valid = rows < e_total
    s_ref[...] = jnp.where(valid, score, NEG_INF).astype(s_ref.dtype)
    v_ref[...] = jnp.where(valid, value, 0.0).astype(v_ref.dtype)


def edge_scores_values(xe, kp, tile_e, n_edges):
    e_pad = xe.shape[0]
    grid = (e_pad // tile_e,)
    weights = [kp["w_fused"], kp["fc2_w"], kp["w_av"], kp["vlin_w"], kp["head_rep"], kp["cvec"]]
    kernel = functools.partial(_edge_kernel, e_total=n_edges, tile_e=tile_e)
    return pl.pallas_call(
        kernel,
        out_shape=(jax.ShapeDtypeStruct((e_pad, HD), jnp.bfloat16),
                   jax.ShapeDtypeStruct((e_pad, HD), jnp.bfloat16)),
        grid=grid,
        in_specs=[pl.BlockSpec((tile_e, PACK_W), lambda i: (i, 0))]
                 + [_const_spec(w.shape) for w in weights],
        out_specs=(pl.BlockSpec((tile_e, HD), lambda i: (i, 0)),
                   pl.BlockSpec((tile_e, HD), lambda i: (i, 0))),
        compiler_params=pltpu.CompilerParams(dimension_semantics=("parallel",),
                                             vmem_limit_bytes=VMEM_LIMIT),
    )(xe, *weights)


# ---------------------------------------------------------------- kernel 2: per-dst tail
# 4 destination nodes are lane-packed per block row.  Segment softmax over the padded
# per-dst edge slots (sentinels carry -1e30 / 0), scatter-sum, proj + residual,
# per-node LayerNorm (block-diagonal averaging matmul), block-diagonal FFN, residual.
def _dst_kernel(s_ref, v_ref, x_ref, proj4_ref, mean4_ref, ffn1_ref, ffn2_ref, dvec_ref,
                out_ref):
    s = s_ref[...].astype(jnp.float32)          # (TD, MD, 128)
    v = v_ref[...].astype(jnp.float32)
    dv = dvec_ref[...]                          # (8, 384) packed vector constants

    m = jnp.max(s, axis=1, keepdims=True)       # per (node, head) max
    p = jnp.exp(s - m)                          # sentinels -> exp(-1e30 - m) = 0
    denom = jnp.sum(p, axis=1, keepdims=True) + 1e-16   # torch_geometric softmax eps
    feat = jnp.sum((p / denom) * v, axis=1)     # (TD, 128) attention-weighted scatter-sum

    # node_output = node_input_dst + proj(attn)
    res = x_ref[...] + _bf16_dot(feat, proj4_ref[...]) + dv[0:1, 0:4 * C]

    # per-node LayerNorm: block-diagonal averaging matmul (kron(I4, 1/32)), f32 operands
    mu = jnp.dot(res, mean4_ref[...], preferred_element_type=jnp.float32)
    xc = res - mu
    var = jnp.dot(xc * xc, mean4_ref[...], preferred_element_type=jnp.float32)
    y = xc * jax.lax.rsqrt(var + LN_EPS) * dv[1:2, 0:4 * C] + dv[2:3, 0:4 * C]

    # FFN (block-diagonal over the 4 packed nodes) + final residual
    hmid = _silu(_bf16_dot(y, ffn1_ref[...]) + dv[3:4, :])
    out_ref[...] = res + _bf16_dot(hmid, ffn2_ref[...]) + dv[4:5, 0:4 * C]


def dst_attention_ffn(s4, v4, x4, kp, tile_d4):
    nd4_pad, max_deg, _ = s4.shape
    grid = (nd4_pad // tile_d4,)
    weights = [kp["proj4"], kp["mean4"], kp["ffn1_4"], kp["ffn2_4"], kp["dvec"]]
    return pl.pallas_call(
        _dst_kernel,
        out_shape=jax.ShapeDtypeStruct((nd4_pad, 4 * C), jnp.float32),
        grid=grid,
        in_specs=[pl.BlockSpec((tile_d4, max_deg, 4 * HD), lambda i: (i, 0, 0)),
                  pl.BlockSpec((tile_d4, max_deg, 4 * HD), lambda i: (i, 0, 0)),
                  pl.BlockSpec((tile_d4, 4 * C), lambda i: (i, 0))]
                 + [_const_spec(w.shape) for w in weights],
        out_specs=pl.BlockSpec((tile_d4, 4 * C), lambda i: (i, 0)),
        compiler_params=pltpu.CompilerParams(dimension_semantics=("parallel",),
                                             vmem_limit_bytes=VMEM_LIMIT),
    )(s4, v4, x4, *weights)


# ---------------------------------------------------------------- kernel-side parameter prep
def _prepare_kernel_params(p):
    f32 = jnp.float32
    bf16 = jnp.bfloat16
    kp = {}

    # --- edge kernel: fused (128, 64) weight [message linear | fc1] ---
    w_msg = jnp.concatenate([p["w_src"], p["w_dst"]], axis=0)            # (64, 32)
    w_fused = jnp.zeros((PACK_W, 2 * C), f32)
    w_fused = w_fused.at[0:2 * C, 0:C].set(w_msg)
    w_fused = w_fused.at[LANE_ESCAL:LANE_ESCAL + EDGE_SCALAR_DIM, C:C + FC_HIDDEN].set(p["fc1_w"])
    kp["w_fused"] = w_fused.astype(bf16)

    # packed (8, 128) vector constants for the edge kernel
    cvec = jnp.zeros((8, PACK_W), f32)
    cvec = cvec.at[0, 0:C].set(p["b_src"] + p["b_dst"])
    cvec = cvec.at[0, C:C + FC_HIDDEN].set(p["fc1_b"])
    cvec = cvec.at[1, 0:FC_HIDDEN].set(p["ln1_g"])
    cvec = cvec.at[2, 0:FC_HIDDEN].set(p["ln1_b"])
    cvec = cvec.at[3, 0:C].set(p["fc2_b"])
    cvec = cvec.at[4, 0:HA + C].set(jnp.concatenate([p["alpha_b"], p["lin_b"]]))
    cvec = cvec.at[5, 0:C].set(p["vdtp_w"])
    cvec = cvec.at[6, 0:HD].set(p["vlin_b"])
    cvec = cvec.at[7, 0:HA].set(p["alpha_dot"])
    kp["cvec"] = cvec

    kp["fc2_w"] = p["fc2_w"].astype(bf16)
    kp["w_av"] = jnp.concatenate([p["alpha_w"], p["lin_w"]], axis=1).astype(bf16)   # (32, 64)
    kp["vlin_w"] = p["vlin_w"].astype(bf16)
    head_rep = ((jnp.arange(HA)[:, None] // ALPHA_HEAD) ==
                (jnp.arange(HD)[None, :] // HEAD_DIM)).astype(f32)                  # (32, 32)
    kp["head_rep"] = head_rep.astype(bf16)

    # --- dst kernel: block-diagonal weights for 4 lane-packed nodes ---
    eye4 = jnp.eye(4, dtype=f32)
    kp["proj4"] = jnp.kron(eye4, p["proj_w"]).astype(bf16)                          # (128, 128)
    kp["mean4"] = jnp.kron(eye4, jnp.full((C, C), 1.0 / C, f32))                    # (128, 128) f32
    kp["ffn1_4"] = jnp.kron(eye4, p["ffn_w1"]).astype(bf16)                         # (128, 384)
    kp["ffn2_4"] = jnp.kron(eye4, p["ffn_w2"]).astype(bf16)                         # (384, 128)
    dvec = jnp.zeros((8, 4 * MLP_MID), f32)                                         # (8, 384)
    dvec = dvec.at[0, 0:4 * C].set(jnp.tile(p["proj_b"], 4))
    dvec = dvec.at[1, 0:4 * C].set(jnp.tile(p["ln2_g"], 4))
    dvec = dvec.at[2, 0:4 * C].set(jnp.tile(p["ln2_b"], 4))
    dvec = dvec.at[3, :].set(jnp.tile(p["ffn_b1"], 4))
    dvec = dvec.at[4, 0:4 * C].set(jnp.tile(p["ffn_b2"], 4))
    kp["dvec"] = dvec
    return kp


# ---------------------------------------------------------------- host-side graph preprocessing
def build_dst_edge_table(edge_dst_np, n_dst, pad_multiple=8):
    """Padded per-destination edge-index table (ELL layout), vectorized. Sentinel = -1."""
    edge_dst_np = np.asarray(edge_dst_np, dtype=np.int64)
    e = int(edge_dst_np.shape[0])
    if e == 0:
        return jnp.full((n_dst, pad_multiple), -1, jnp.int32)
    counts = np.bincount(edge_dst_np, minlength=n_dst)
    max_deg = int(_round_up(max(int(counts.max()), 1), pad_multiple))
    order = np.argsort(edge_dst_np, kind="stable")
    sorted_dst = edge_dst_np[order]
    starts = np.zeros(n_dst, np.int64)
    starts[1:] = np.cumsum(counts)[:-1]
    rank = np.arange(e, dtype=np.int64) - starts[sorted_dst]
    table = np.full((n_dst, max_deg), -1, dtype=np.int32)
    table[sorted_dst, rank] = order.astype(np.int32)
    return jnp.asarray(table)


# ---------------------------------------------------------------- full EquiformerBlock forward
@jax.jit
def equiformer_block_forward(params, node_input_src, node_input_dst, batch_dst,
                             edge_src, edge_dst, edge_attr, edge_scalars, edge_table):
    del batch_dst  # unused (0e-only LayerNorm ignores batch; drop_path is None)
    E = edge_src.shape[0]
    n_dst = node_input_dst.shape[0]
    max_deg = edge_table.shape[1]
    f32 = jnp.float32

    kp = _prepare_kernel_params(params)

    # ---- per-edge phase (tiled over edge blocks) ----
    # >=2 grid steps when the problem allows (v7x dual-TC), cap 1024 rows / tile.
    tile_e = max(32, min(1024, _round_up(_cdiv(E + 1, 2), 32)))
    e_pad = _round_up(E + 1, tile_e)        # >= E+1 so row E is a guaranteed sentinel row

    # packed lane-dense per-edge input: [x_src | x_dst | eattr*32 | escal | 0]
    eattr32 = jnp.broadcast_to(edge_attr.astype(f32), (E, HD))
    xe = jnp.concatenate(
        [node_input_src[edge_src].astype(f32),
         node_input_dst[edge_dst].astype(f32),
         eattr32,
         edge_scalars.astype(f32),
         jnp.zeros((E, PACK_W - (2 * C + HD + EDGE_SCALAR_DIM)), f32)], axis=-1)
    xe = jnp.pad(xe, ((0, e_pad - E), (0, 0)))

    scores, values = edge_scores_values(xe, kp, tile_e, E)   # (e_pad, 32) bf16 each

    # ---- per-dst phase (4 destination nodes lane-packed per block row) ----
    nd4 = _cdiv(n_dst, 4)
    cap_vmem = max(8, ((DST_SV_BUDGET // (max_deg * 1024)) // 8) * 8)   # bf16, 2 in x 2 buf
    cap_half = max(8, _round_up(_cdiv(nd4, 2), 8))
    tile_d4 = max(8, min(512, cap_vmem, cap_half))
    nd4_pad = _round_up(nd4, tile_d4)
    nd_pad = 4 * nd4_pad

    # ELL table: sentinels (and padded dst rows) point at edge row E (score=-1e30, value=0)
    table = jnp.where(edge_table < 0, E, edge_table).astype(jnp.int32)
    table = jnp.pad(table, ((0, nd_pad - n_dst), (0, 0)), constant_values=E)
    table4 = table.reshape(nd4_pad, 4, max_deg).transpose(0, 2, 1)      # (nd4_pad, MD, 4)

    # gather glue (pure indexing) in plain JAX; rows are only 64 B so a per-row DMA
    # gather inside the kernel would be descriptor-bound.
    s4 = scores[table4].reshape(nd4_pad, max_deg, 4 * HD)               # bf16
    v4 = values[table4].reshape(nd4_pad, max_deg, 4 * HD)               # bf16
    x4 = jnp.pad(node_input_dst.astype(f32), ((0, nd_pad - n_dst), (0, 0))).reshape(nd4_pad, 4 * C)

    out4 = dst_attention_ffn(s4, v4, x4, kp, tile_d4)                   # (nd4_pad, 128) f32
    return out4.reshape(nd_pad, C)[:n_dst]


# ---------------------------------------------------------------- deterministic parameter init
def init_params(key):
    ks = jax.random.split(key, 16)

    def w(k, shape):
        fan_in = shape[0]
        return jax.random.normal(k, shape, jnp.float32) / jnp.sqrt(jnp.float32(fan_in))

    p = {}
    p["w_src"] = w(ks[0], (C, C));      p["b_src"] = jnp.zeros((C,), jnp.float32)   # src_bias=False
    p["w_dst"] = w(ks[1], (C, C));      p["b_dst"] = jnp.zeros((C,), jnp.float32)
    # GraphAttentionMLP / SeparableFCTP parameters
    p["fc1_w"] = w(ks[2], (EDGE_SCALAR_DIM, FC_HIDDEN)); p["fc1_b"] = jnp.zeros((FC_HIDDEN,), jnp.float32)
    p["ln1_g"] = jnp.ones((FC_HIDDEN,), jnp.float32);    p["ln1_b"] = jnp.zeros((FC_HIDDEN,), jnp.float32)
    p["fc2_w"] = w(ks[3], (FC_HIDDEN, C));               p["fc2_b"] = jnp.zeros((C,), jnp.float32)
    p["alpha_w"] = w(ks[4], (C, HA));   p["alpha_b"] = jnp.zeros((HA,), jnp.float32)
    p["lin_w"] = w(ks[5], (C, C));      p["lin_b"] = jnp.zeros((C,), jnp.float32)
    p["vdtp_w"] = jax.random.normal(ks[6], (C,), jnp.float32)
    p["vlin_w"] = w(ks[7], (C, HD));    p["vlin_b"] = jnp.zeros((HD,), jnp.float32)
    p["alpha_dot"] = jax.random.normal(ks[8], (HA,), jnp.float32)
    p["proj_w"] = w(ks[9], (HD, C));    p["proj_b"] = jnp.zeros((C,), jnp.float32)
    # norm_2 + FFN
    p["ln2_g"] = jnp.ones((C,), jnp.float32); p["ln2_b"] = jnp.zeros((C,), jnp.float32)
    p["ffn_w1"] = w(ks[10], (C, MLP_MID)); p["ffn_b1"] = jnp.zeros((MLP_MID,), jnp.float32)
    p["ffn_w2"] = w(ks[11], (MLP_MID, C)); p["ffn_b2"] = jnp.zeros((C,), jnp.float32)
    return p


if __name__ == "__main__":
    key = jax.random.PRNGKey(0)
    k_param, k_src, k_dst, k_es, k_ed, k_ea, k_esc = jax.random.split(key, 7)

    N_SRC, N_DST, E = 16, 8, 32
    params = init_params(k_param)

    node_input_src = jax.random.normal(k_src, (N_SRC, C), jnp.float32)
    node_input_dst = jax.random.normal(k_dst, (N_DST, C), jnp.float32)
    batch_dst = jnp.zeros((N_DST,), jnp.int32)
    edge_src = jax.random.randint(k_es, (E,), 0, N_SRC)
    edge_dst = jax.random.randint(k_ed, (E,), 0, N_DST)
    edge_attr = jax.random.normal(k_ea, (E, 1), jnp.float32)          # "1x0e" edge attr
    edge_scalars = jax.random.normal(k_esc, (E, EDGE_SCALAR_DIM), jnp.float32)

    # host-side graph preprocessing (vectorized ELL table build)
    edge_table = build_dst_edge_table(np.asarray(jax.device_get(edge_dst)), N_DST)

    out = equiformer_block_forward(params, node_input_src, node_input_dst, batch_dst,
                                   edge_src, edge_dst, edge_attr, edge_scalars, edge_table)
    out = jax.block_until_ready(out)
    assert out.shape == (N_DST, C)
    assert bool(jnp.all(jnp.isfinite(out)))
    print("KERNEL_OK")
</pallas_src>

<mosaic_0001>
module attributes {stable_mosaic.version = 11 : i64} {
  func.func @_edge_kernel(%arg0: i32, %arg1: memref<32x128xf32, #tpu.memory_space<vmem>>, %arg2: memref<128x64xbf16, #tpu.memory_space<vmem>>, %arg3: memref<16x32xbf16, #tpu.memory_space<vmem>>, %arg4: memref<32x64xbf16, #tpu.memory_space<vmem>>, %arg5: memref<32x32xbf16, #tpu.memory_space<vmem>>, %arg6: memref<32x32xbf16, #tpu.memory_space<vmem>>, %arg7: memref<8x128xf32, #tpu.memory_space<vmem>>, %arg8: memref<32x32xbf16, #tpu.memory_space<vmem>>, %arg9: memref<32x32xbf16, #tpu.memory_space<vmem>>) attributes {dimension_semantics = [#tpu.dimension_semantics<parallel>], iteration_bounds = array<i64: 2>, scalar_prefetch = 0 : i64, scratch_operands = 0 : i64, tpu.core_type = #tpu.core_type<tc>, window_params = [{transform_indices = @transform_0, window_bounds = array<i64: 32, 128>}, {pipeline_mode = #tpu.pipeline_mode<synchronous>, transform_indices = @transform_1, window_bounds = array<i64: 128, 64>}, {pipeline_mode = #tpu.pipeline_mode<synchronous>, transform_indices = @transform_2, window_bounds = array<i64: 16, 32>}, {pipeline_mode = #tpu.pipeline_mode<synchronous>, transform_indices = @transform_3, window_bounds = array<i64: 32, 64>}, {pipeline_mode = #tpu.pipeline_mode<synchronous>, transform_indices = @transform_4, window_bounds = array<i64: 32, 32>}, {pipeline_mode = #tpu.pipeline_mode<synchronous>, transform_indices = @transform_5, window_bounds = array<i64: 32, 32>}, {pipeline_mode = #tpu.pipeline_mode<synchronous>, transform_indices = @transform_6, window_bounds = array<i64: 8, 128>}, {transform_indices = @transform_7, window_bounds = array<i64: 32, 32>}, {transform_indices = @transform_8, window_bounds = array<i64: 32, 32>}]} {
    %c0 = arith.constant 0 : index
    %c0_0 = arith.constant 0 : index
    %0 = vector.load %arg1[%c0, %c0_0] : memref<32x128xf32, #tpu.memory_space<vmem>>, vector<32x128xf32>
    %c0_1 = arith.constant 0 : index
    %c0_2 = arith.constant 0 : index
    %1 = vector.load %arg7[%c0_1, %c0_2] : memref<8x128xf32, #tpu.memory_space<vmem>>, vector<8x128xf32>
    %c0_3 = arith.constant 0 : index
    %c0_4 = arith.constant 0 : index
    %2 = vector.load %arg2[%c0_3, %c0_4] : memref<128x64xbf16, #tpu.memory_space<vmem>>, vector<128x64xbf16>
    %3 = arith.truncf %0 : vector<32x128xf32> to vector<32x128xbf16>
    %cst = arith.constant dense<0.000000e+00> : vector<32x64xf32>
    %4 = tpu.matmul %3, %2, %cst {dimension_numbers = #tpu.dot_dimension_numbers<[1], [0], [0], [1], [0, 0, 1, 1], [], []>} : vector<32x128xbf16>, vector<128x64xbf16>, vector<32x64xf32> -> vector<32x64xf32>
    %5 = vector.extract_strided_slice %1 {offsets = [0, 0], sizes = [1, 64], strides = [1, 1]} : vector<8x128xf32> to vector<1x64xf32>
    %6 = vector.broadcast %5 : vector<1x64xf32> to vector<32x64xf32>
    %7 = arith.addf %4, %6 : vector<32x64xf32>
    %8 = vector.extract_strided_slice %7 {offsets = [0, 0], sizes = [32, 32], strides = [1, 1]} : vector<32x64xf32> to vector<32x32xf32>
    %9 = vector.extract_strided_slice %7 {offsets = [0, 32], sizes = [32, 16], strides = [1, 1]} : vector<32x64xf32> to vector<32x16xf32>
    %10 = vector.extract_strided_slice %0 {offsets = [0, 64], sizes = [32, 32], strides = [1, 1]} : vector<32x128xf32> to vector<32x32xf32>
    %11 = vector.extract_strided_slice %1 {offsets = [1, 0], sizes = [1, 16], strides = [1, 1]} : vector<8x128xf32> to vector<1x16xf32>
    %12 = vector.extract_strided_slice %1 {offsets = [2, 0], sizes = [1, 16], strides = [1, 1]} : vector<8x128xf32> to vector<1x16xf32>
    %cst_5 = arith.constant dense<0.000000e+00> : vector<32xf32>
    %13 = vector.multi_reduction <add>, %9, %cst_5 [1] : vector<32x16xf32> to vector<32xf32>
    %14 = vector.shape_cast %13 : vector<32xf32> to vector<32x1xf32>
    %cst_6 = arith.constant 1.600000e+01 : f32
    %15 = vector.broadcast %cst_6 : f32 to vector<32x1xf32>
    %16 = arith.divf %14, %15 : vector<32x1xf32>
    %17 = vector.broadcast %16 : vector<32x1xf32> to vector<32x16xf32>
    %18 = arith.subf %9, %17 : vector<32x16xf32>
    %19 = arith.mulf %18, %18 : vector<32x16xf32>
    %cst_7 = arith.constant dense<0.000000e+00> : vector<32xf32>
    %20 = vector.multi_reduction <add>, %19, %cst_7 [1] : vector<32x16xf32> to vector<32xf32>
    %21 = vector.shape_cast %20 : vector<32xf32> to vector<32x1xf32>
    %cst_8 = arith.constant 1.600000e+01 : f32
    %22 = vector.broadcast %cst_8 : f32 to vector<32x1xf32>
    %23 = arith.divf %21, %22 : vector<32x1xf32>
    %cst_9 = arith.constant 9.99999974E-6 : f32
    %24 = vector.broadcast %cst_9 : f32 to vector<32x1xf32>
    %25 = arith.addf %23, %24 : vector<32x1xf32>
    %26 = math.rsqrt %25 : vector<32x1xf32>
    %27 = vector.broadcast %26 : vector<32x1xf32> to vector<32x16xf32>
    %28 = arith.mulf %18, %27 : vector<32x16xf32>
    %29 = vector.broadcast %11 : vector<1x16xf32> to vector<32x16xf32>
    %30 = arith.mulf %28, %29 : vector<32x16xf32>
    %31 = vector.broadcast %12 : vector<1x16xf32> to vector<32x16xf32>
    %32 = arith.addf %30, %31 : vector<32x16xf32>
    %33 = arith.negf %32 : vector<32x16xf32>
    %34 = math.exp %33 : vector<32x16xf32>
    %cst_10 = arith.constant 1.000000e+00 : f32
    %35 = vector.broadcast %cst_10 : f32 to vector<32x16xf32>
    %36 = arith.addf %35, %34 : vector<32x16xf32>
    %37 = arith.divf %35, %36 : vector<32x16xf32>
    %38 = arith.mulf %32, %37 : vector<32x16xf32>
    %c0_11 = arith.constant 0 : index
    %c0_12 = arith.constant 0 : index
    %39 = vector.load %arg3[%c0_11, %c0_12] : memref<16x32xbf16, #tpu.memory_space<vmem>>, vector<16x32xbf16>
    %40 = arith.truncf %38 : vector<32x16xf32> to vector<32x16xbf16>
    %cst_13 = arith.constant dense<0.000000e+00> : vector<32x32xf32>
    %41 = tpu.matmul %40, %39, %cst_13 {dimension_numbers = #tpu.dot_dimension_numbers<[1], [0], [0], [1], [0, 0, 1, 1], [], []>} : vector<32x16xbf16>, vector<16x32xbf16>, vector<32x32xf32> -> vector<32x32xf32>
    %42 = vector.extract_strided_slice %1 {offsets = [3, 0], sizes = [1, 32], strides = [1, 1]} : vector<8x128xf32> to vector<1x32xf32>
    %43 = vector.broadcast %42 : vector<1x32xf32> to vector<32x32xf32>
    %44 = arith.addf %41, %43 : vector<32x32xf32>
    %45 = arith.mulf %8, %10 : vector<32x32xf32>
    %46 = arith.mulf %45, %44 : vector<32x32xf32>
    %c0_14 = arith.constant 0 : index
    %c0_15 = arith.constant 0 : index
    %47 = vector.load %arg4[%c0_14, %c0_15] : memref<32x64xbf16, #tpu.memory_space<vmem>>, vector<32x64xbf16>
    %48 = arith.truncf %46 : vector<32x32xf32> to vector<32x32xbf16>
    %cst_16 = arith.constant dense<0.000000e+00> : vector<32x64xf32>
    %49 = tpu.matmul %48, %47, %cst_16 {dimension_numbers = #tpu.dot_dimension_numbers<[1], [0], [0], [1], [0, 0, 1, 1], [], []>} : vector<32x32xbf16>, vector<32x64xbf16>, vector<32x64xf32> -> vector<32x64xf32>
    %50 = vector.extract_strided_slice %1 {offsets = [4, 0], sizes = [1, 64], strides = [1, 1]} : vector<8x128xf32> to vector<1x64xf32>
    %51 = vector.broadcast %50 : vector<1x64xf32> to vector<32x64xf32>
    %52 = arith.addf %49, %51 : vector<32x64xf32>
    %53 = vector.extract_strided_slice %52 {offsets = [0, 0], sizes = [32, 32], strides = [1, 1]} : vector<32x64xf32> to vector<32x32xf32>
    %cst_17 = arith.constant 6.000000e-01 : f32
    %54 = vector.broadcast %cst_17 : f32 to vector<32x32xf32>
    %55 = arith.mulf %54, %53 : vector<32x32xf32>
    %cst_18 = arith.constant 4.000000e-01 : f32
    %56 = vector.broadcast %cst_18 : f32 to vector<32x32xf32>
    %57 = arith.mulf %56, %53 : vector<32x32xf32>
    %58 = arith.negf %53 : vector<32x32xf32>
    %59 = math.exp %58 : vector<32x32xf32>
    %cst_19 = arith.constant 1.000000e+00 : f32
    %60 = vector.broadcast %cst_19 : f32 to vector<32x32xf32>
    %61 = arith.addf %60, %59 : vector<32x32xf32>
    %62 = arith.divf %60, %61 : vector<32x32xf32>
    %cst_20 = arith.constant 2.000000e+00 : f32
    %63 = vector.broadcast %cst_20 : f32 to vector<32x32xf32>
    %64 = arith.mulf %63, %62 : vector<32x32xf32>
    %cst_21 = arith.constant 1.000000e+00 : f32
    %65 = vector.broadcast %cst_21 : f32 to vector<32x32xf32>
    %66 = arith.subf %64, %65 : vector<32x32xf32>
    %67 = arith.mulf %57, %66 : vector<32x32xf32>
    %68 = arith.addf %55, %67 : vector<32x32xf32>
    %69 = vector.extract_strided_slice %1 {offsets = [7, 0], sizes = [1, 32], strides = [1, 1]} : vector<8x128xf32> to vector<1x32xf32>
    %70 = vector.broadcast %69 : vector<1x32xf32> to vector<32x32xf32>
    %71 = arith.mulf %68, %70 : vector<32x32xf32>
    %72 = vector.extract_strided_slice %52 {offsets = [0, 32], sizes = [32, 32], strides = [1, 1]} : vector<32x64xf32> to vector<32x32xf32>
    %73 = arith.negf %72 : vector<32x32xf32>
    %74 = math.exp %73 : vector<32x32xf32>
    %cst_22 = arith.constant 1.000000e+00 : f32
    %75 = vector.broadcast %cst_22 : f32 to vector<32x32xf32>
    %76 = arith.addf %75, %74 : vector<32x32xf32>
    %77 = arith.divf %75, %76 : vector<32x32xf32>
    %78 = arith.mulf %72, %77 : vector<32x32xf32>
    %79 = arith.mulf %78, %10 : vector<32x32xf32>
    %80 = vector.extract_strided_slice %1 {offsets = [5, 0], sizes = [1, 32], strides = [1, 1]} : vector<8x128xf32> to vector<1x32xf32>
    %81 = vector.broadcast %80 : vector<1x32xf32> to vector<32x32xf32>
    %82 = arith.mulf %79, %81 : vector<32x32xf32>
    %c0_23 = arith.constant 0 : index
    %c0_24 = arith.constant 0 : index
    %83 = vector.load %arg5[%c0_23, %c0_24] : memref<32x32xbf16, #tpu.memory_space<vmem>>, vector<32x32xbf16>
    %84 = arith.truncf %82 : vector<32x32xf32> to vector<32x32xbf16>
    %cst_25 = arith.constant dense<0.000000e+00> : vector<32x32xf32>
    %85 = tpu.matmul %84, %83, %cst_25 {dimension_numbers = #tpu.dot_dimension_numbers<[1], [0], [0], [1], [0, 0, 1, 1], [], []>} : vector<32x32xbf16>, vector<32x32xbf16>, vector<32x32xf32> -> vector<32x32xf32>
    %86 = vector.extract_strided_slice %1 {offsets = [6, 0], sizes = [1, 32], strides = [1, 1]} : vector<8x128xf32> to vector<1x32xf32>
    %87 = vector.broadcast %86 : vector<1x32xf32> to vector<32x32xf32>
    %88 = arith.addf %85, %87 : vector<32x32xf32>
    %c0_26 = arith.constant 0 : index
    %c0_27 = arith.constant 0 : index
    %89 = vector.load %arg6[%c0_26, %c0_27] : memref<32x32xbf16, #tpu.memory_space<vmem>>, vector<32x32xbf16>
    %90 = arith.truncf %71 : vector<32x32xf32> to vector<32x32xbf16>
    %cst_28 = arith.constant dense<0.000000e+00> : vector<32x32xf32>
    %91 = tpu.matmul %90, %89, %cst_28 {dimension_numbers = #tpu.dot_dimension_numbers<[1], [0], [0], [1], [0, 0, 1, 1], [], []>} : vector<32x32xbf16>, vector<32x32xbf16>, vector<32x32xf32> -> vector<32x32xf32>
    %92 = tpu.iota {dimensions = array<i32: 0>} : vector<32x1xi32>
    %c32_i32 = arith.constant 32 : i32
    %93 = arith.muli %arg0, %c32_i32 : i32
    %94 = vector.broadcast %93 : i32 to vector<32x1xi32>
    %95 = arith.addi %92, %94 : vector<32x1xi32>
    %c32_i32_29 = arith.constant 32 : i32
    %96 = vector.broadcast %c32_i32_29 : i32 to vector<32x1xi32>
    %97 = arith.cmpi slt, %95, %96 : vector<32x1xi32>
    %cst_30 = arith.constant -1.000000e+30 : f32
    %98 = vector.shape_cast %97 : vector<32x1xi1> to vector<32x1xi1>
    %99 = vector.broadcast %98 : vector<32x1xi1> to vector<32x32xi1>
    %100 = vector.broadcast %cst_30 : f32 to vector<32x32xf32>
    %101 = arith.select %99, %91, %100 : vector<32x32xi1>, vector<32x32xf32>
    %102 = arith.truncf %101 : vector<32x32xf32> to vector<32x32xbf16>
    %c0_31 = arith.constant 0 : index
    %c0_32 = arith.constant 0 : index
    %103 = vector.load %arg8[%c0_31, %c0_32] : memref<32x32xbf16, #tpu.memory_space<vmem>>, vector<32x32xbf16>
    tpu.vector_store %arg8[%c0_31, %c0_32], %102 {strides = array<i32>} : memref<32x32xbf16, #tpu.memory_space<vmem>>, vector<32x32xbf16>,
    %cst_33 = arith.constant 0.000000e+00 : f32
    %104 = vector.shape_cast %97 : vector<32x1xi1> to vector<32x1xi1>
    %105 = vector.broadcast %104 : vector<32x1xi1> to vector<32x32xi1>
    %106 = vector.broadcast %cst_33 : f32 to vector<32x32xf32>
    %107 = arith.select %105, %88, %106 : vector<32x32xi1>, vector<32x32xf32>
    %108 = arith.truncf %107 : vector<32x32xf32> to vector<32x32xbf16>
    %c0_34 = arith.constant 0 : index
    %c0_35 = arith.constant 0 : index
    %109 = vector.load %arg9[%c0_34, %c0_35] : memref<32x32xbf16, #tpu.memory_space<vmem>>, vector<32x32xbf16>
    tpu.vector_store %arg9[%c0_34, %c0_35], %108 {strides = array<i32>} : memref<32x32xbf16, #tpu.memory_space<vmem>>, vector<32x32xbf16>,
    return
  }
  func.func @transform_0(%arg0: i32) -> (i32, i32) {
    %c0_i32 = arith.constant 0 : i32
    %c0_i32_0 = arith.constant 0 : i32
    return %arg0, %c0_i32 : i32, i32
  }
  func.func @transform_1(%arg0: i32) -> (i32, i32) {
    %c0_i32 = arith.constant 0 : i32
    %c0_i32_0 = arith.constant 0 : i32
    %c0_i32_1 = arith.constant 0 : i32
    return %c0_i32, %c0_i32_0 : i32, i32
  }
  func.func @transform_2(%arg0: i32) -> (i32, i32) {
    %c0_i32 = arith.constant 0 : i32
    %c0_i32_0 = arith.constant 0 : i32
    %c0_i32_1 = arith.constant 0 : i32
    return %c0_i32, %c0_i32_0 : i32, i32
  }
  func.func @transform_3(%arg0: i32) -> (i32, i32) {
    %c0_i32 = arith.constant 0 : i32
    %c0_i32_0 = arith.constant 0 : i32
    %c0_i32_1 = arith.constant 0 : i32
    return %c0_i32, %c0_i32_0 : i32, i32
  }
  func.func @transform_4(%arg0: i32) -> (i32, i32) {
    %c0_i32 = arith.constant 0 : i32
    %c0_i32_0 = arith.constant 0 : i32
    %c0_i32_1 = arith.constant 0 : i32
    return %c0_i32, %c0_i32_0 : i32, i32
  }
  func.func @transform_5(%arg0: i32) -> (i32, i32) {
    %c0_i32 = arith.constant 0 : i32
    %c0_i32_0 = arith.constant 0 : i32
    %c0_i32_1 = arith.constant 0 : i32
    return %c0_i32, %c0_i32_0 : i32, i32
  }
  func.func @transform_6(%arg0: i32) -> (i32, i32) {
    %c0_i32 = arith.constant 0 : i32
    %c0_i32_0 = arith.constant 0 : i32
    %c0_i32_1 = arith.constant 0 : i32
    return %c0_i32, %c0_i32_0 : i32, i32
  }
  func.func @transform_7(%arg0: i32) -> (i32, i32) {
    %c0_i32 = arith.constant 0 : i32
    %c0_i32_0 = arith.constant 0 : i32
    return %arg0, %c0_i32 : i32, i32
  }
  func.func @transform_8(%arg0: i32) -> (i32, i32) {
    %c0_i32 = arith.constant 0 : i32
    %c0_i32_0 = arith.constant 0 : i32
    return %arg0, %c0_i32 : i32, i32
  }
}

module attributes {stable_mosaic.version = 11 : i64} {
  func.func @_dst_kernel(%arg0: i32, %arg1: memref<8x8x128xbf16, #tpu.memory_space<vmem>>, %arg2: memref<8x8x128xbf16, #tpu.memory_space<vmem>>, %arg3: memref<8x128xf32, #tpu.memory_space<vmem>>, %arg4: memref<128x128xbf16, #tpu.memory_space<vmem>>, %arg5: memref<128x128xf32, #tpu.memory_space<vmem>>, %arg6: memref<128x384xbf16, #tpu.memory_space<vmem>>, %arg7: memref<384x128xbf16, #tpu.memory_space<vmem>>, %arg8: memref<8x384xf32, #tpu.memory_space<vmem>>, %arg9: memref<8x128xf32, #tpu.memory_space<vmem>>) attributes {dimension_semantics = [#tpu.dimension_semantics<parallel>], iteration_bounds = array<i64: 1>, scalar_prefetch = 0 : i64, scratch_operands = 0 : i64, tpu.core_type = #tpu.core_type<tc>, window_params = [{transform_indices = @transform_0, window_bounds = array<i64: 8, 8, 128>}, {transform_indices = @transform_1, window_bounds = array<i64: 8, 8, 128>}, {transform_indices = @transform_2, window_bounds = array<i64: 8, 128>}, {pipeline_mode = #tpu.pipeline_mode<synchronous>, transform_indices = @transform_3, window_bounds = array<i64: 128, 128>}, {pipeline_mode = #tpu.pipeline_mode<synchronous>, transform_indices = @transform_4, window_bounds = array<i64: 128, 128>}, {pipeline_mode = #tpu.pipeline_mode<synchronous>, transform_indices = @transform_5, window_bounds = array<i64: 128, 384>}, {pipeline_mode = #tpu.pipeline_mode<synchronous>, transform_indices = @transform_6, window_bounds = array<i64: 384, 128>}, {pipeline_mode = #tpu.pipeline_mode<synchronous>, transform_indices = @transform_7, window_bounds = array<i64: 8, 384>}, {transform_indices = @transform_8, window_bounds = array<i64: 8, 128>}]} {
    %c0 = arith.constant 0 : index
    %c0_0 = arith.constant 0 : index
    %c0_1 = arith.constant 0 : index
    %0 = vector.load %arg1[%c0, %c0_0, %c0_1] : memref<8x8x128xbf16, #tpu.memory_space<vmem>>, vector<8x8x128xbf16>
    %1 = arith.extf %0 : vector<8x8x128xbf16> to vector<8x8x128xf32>
    %c0_2 = arith.constant 0 : index
    %c0_3 = arith.constant 0 : index
    %c0_4 = arith.constant 0 : index
    %2 = vector.load %arg2[%c0_2, %c0_3, %c0_4] : memref<8x8x128xbf16, #tpu.memory_space<vmem>>, vector<8x8x128xbf16>
    %3 = arith.extf %2 : vector<8x8x128xbf16> to vector<8x8x128xf32>
    %c0_5 = arith.constant 0 : index
    %c0_6 = arith.constant 0 : index
    %4 = vector.load %arg8[%c0_5, %c0_6] : memref<8x384xf32, #tpu.memory_space<vmem>>, vector<8x384xf32>
    %cst = arith.constant dense<0xFF800000> : vector<8x128xf32>
    %5 = vector.multi_reduction <maximumf>, %1, %cst [1] : vector<8x8x128xf32> to vector<8x128xf32>
    %6 = vector.shape_cast %5 : vector<8x128xf32> to vector<8x1x128xf32>
    %7 = vector.broadcast %6 : vector<8x1x128xf32> to vector<8x8x128xf32>
    %8 = arith.subf %1, %7 : vector<8x8x128xf32>
    %9 = math.exp %8 : vector<8x8x128xf32>
    %cst_7 = arith.constant dense<0.000000e+00> : vector<8x128xf32>
    %10 = vector.multi_reduction <add>, %9, %cst_7 [1] : vector<8x8x128xf32> to vector<8x128xf32>
    %11 = vector.shape_cast %10 : vector<8x128xf32> to vector<8x1x128xf32>
    %cst_8 = arith.constant 1.000000e-16 : f32
    %12 = vector.broadcast %cst_8 : f32 to vector<8x1x128xf32>
    %13 = arith.addf %11, %12 : vector<8x1x128xf32>
    %14 = vector.broadcast %13 : vector<8x1x128xf32> to vector<8x8x128xf32>
    %15 = arith.divf %9, %14 : vector<8x8x128xf32>
    %16 = arith.mulf %15, %3 : vector<8x8x128xf32>
    %cst_9 = arith.constant dense<0.000000e+00> : vector<8x128xf32>
    %17 = vector.multi_reduction <add>, %16, %cst_9 [1] : vector<8x8x128xf32> to vector<8x128xf32>
    %c0_10 = arith.constant 0 : index
    %c0_11 = arith.constant 0 : index
    %18 = vector.load %arg3[%c0_10, %c0_11] : memref<8x128xf32, #tpu.memory_space<vmem>>, vector<8x128xf32>
    %c0_12 = arith.constant 0 : index
    %c0_13 = arith.constant 0 : index
    %19 = vector.load %arg4[%c0_12, %c0_13] : memref<128x128xbf16, #tpu.memory_space<vmem>>, vector<128x128xbf16>
    %20 = arith.truncf %17 : vector<8x128xf32> to vector<8x128xbf16>
    %cst_14 = arith.constant dense<0.000000e+00> : vector<8x128xf32>
    %21 = tpu.matmul %20, %19, %cst_14 {dimension_numbers = #tpu.dot_dimension_numbers<[1], [0], [0], [1], [0, 0, 1, 1], [], []>} : vector<8x128xbf16>, vector<128x128xbf16>, vector<8x128xf32> -> vector<8x128xf32>
    %22 = arith.addf %18, %21 : vector<8x128xf32>
    %23 = vector.extract_strided_slice %4 {offsets = [0, 0], sizes = [1, 128], strides = [1, 1]} : vector<8x384xf32> to vector<1x128xf32>
    %24 = vector.broadcast %23 : vector<1x128xf32> to vector<8x128xf32>
    %25 = arith.addf %22, %24 : vector<8x128xf32>
    %c0_15 = arith.constant 0 : index
    %c0_16 = arith.constant 0 : index
    %26 = vector.load %arg5[%c0_15, %c0_16] : memref<128x128xf32, #tpu.memory_space<vmem>>, vector<128x128xf32>
    %cst_17 = arith.constant dense<0.000000e+00> : vector<8x128xf32>
    %27 = tpu.matmul %25, %26, %cst_17 {dimension_numbers = #tpu.dot_dimension_numbers<[1], [0], [0], [1], [0, 0, 1, 1], [], []>} : vector<8x128xf32>, vector<128x128xf32>, vector<8x128xf32> -> vector<8x128xf32>
    %28 = arith.subf %25, %27 : vector<8x128xf32>
    %29 = arith.mulf %28, %28 : vector<8x128xf32>
    %c0_18 = arith.constant 0 : index
    %c0_19 = arith.constant 0 : index
    %30 = vector.load %arg5[%c0_18, %c0_19] : memref<128x128xf32, #tpu.memory_space<vmem>>, vector<128x128xf32>
    %cst_20 = arith.constant dense<0.000000e+00> : vector<8x128xf32>
    %31 = tpu.matmul %29, %30, %cst_20 {dimension_numbers = #tpu.dot_dimension_numbers<[1], [0], [0], [1], [0, 0, 1, 1], [], []>} : vector<8x128xf32>, vector<128x128xf32>, vector<8x128xf32> -> vector<8x128xf32>
    %cst_21 = arith.constant 9.99999974E-6 : f32
    %32 = vector.broadcast %cst_21 : f32 to vector<8x128xf32>
    %33 = arith.addf %31, %32 : vector<8x128xf32>
    %34 = math.rsqrt %33 : vector<8x128xf32>
    %35 = arith.mulf %28, %34 : vector<8x128xf32>
    %36 = vector.extract_strided_slice %4 {offsets = [1, 0], sizes = [1, 128], strides = [1, 1]} : vector<8x384xf32> to vector<1x128xf32>
    %37 = vector.broadcast %36 : vector<1x128xf32> to vector<8x128xf32>
    %38 = arith.mulf %35, %37 : vector<8x128xf32>
    %39 = vector.extract_strided_slice %4 {offsets = [2, 0], sizes = [1, 128], strides = [1, 1]} : vector<8x384xf32> to vector<1x128xf32>
    %40 = vector.broadcast %39 : vector<1x128xf32> to vector<8x128xf32>
    %41 = arith.addf %38, %40 : vector<8x128xf32>
    %c0_22 = arith.constant 0 : index
    %c0_23 = arith.constant 0 : index
    %42 = vector.load %arg6[%c0_22, %c0_23] : memref<128x384xbf16, #tpu.memory_space<vmem>>, vector<128x384xbf16>
    %43 = arith.truncf %41 : vector<8x128xf32> to vector<8x128xbf16>
    %cst_24 = arith.constant dense<0.000000e+00> : vector<8x384xf32>
    %44 = tpu.matmul %43, %42, %cst_24 {dimension_numbers = #tpu.dot_dimension_numbers<[1], [0], [0], [1], [0, 0, 1, 1], [], []>} : vector<8x128xbf16>, vector<128x384xbf16>, vector<8x384xf32> -> vector<8x384xf32>
    %45 = vector.extract_strided_slice %4 {offsets = [3, 0], sizes = [1, 384], strides = [1, 1]} : vector<8x384xf32> to vector<1x384xf32>
    %46 = vector.broadcast %45 : vector<1x384xf32> to vector<8x384xf32>
    %47 = arith.addf %44, %46 : vector<8x384xf32>
    %48 = arith.negf %47 : vector<8x384xf32>
    %49 = math.exp %48 : vector<8x384xf32>
    %cst_25 = arith.constant 1.000000e+00 : f32
    %50 = vector.broadcast %cst_25 : f32 to vector<8x384xf32>
    %51 = arith.addf %50, %49 : vector<8x384xf32>
    %52 = arith.divf %50, %51 : vector<8x384xf32>
    %53 = arith.mulf %47, %52 : vector<8x384xf32>
    %c0_26 = arith.constant 0 : index
    %c0_27 = arith.constant 0 : index
    %54 = vector.load %arg7[%c0_26, %c0_27] : memref<384x128xbf16, #tpu.memory_space<vmem>>, vector<384x128xbf16>
    %55 = arith.truncf %53 : vector<8x384xf32> to vector<8x384xbf16>
    %cst_28 = arith.constant dense<0.000000e+00> : vector<8x128xf32>
    %56 = tpu.matmul %55, %54, %cst_28 {dimension_numbers = #tpu.dot_dimension_numbers<[1], [0], [0], [1], [0, 0, 1, 1], [], []>} : vector<8x384xbf16>, vector<384x128xbf16>, vector<8x128xf32> -> vector<8x128xf32>
    %57 = arith.addf %25, %56 : vector<8x128xf32>
    %58 = vector.extract_strided_slice %4 {offsets = [4, 0], sizes = [1, 128], strides = [1, 1]} : vector<8x384xf32> to vector<1x128xf32>
    %59 = vector.broadcast %58 : vector<1x128xf32> to vector<8x128xf32>
    %60 = arith.addf %57, %59 : vector<8x128xf32>
    %c0_29 = arith.constant 0 : index
    %c0_30 = arith.constant 0 : index
    %61 = vector.load %arg9[%c0_29, %c0_30] : memref<8x128xf32, #tpu.memory_space<vmem>>, vector<8x128xf32>
    tpu.vector_store %arg9[%c0_29, %c0_30], %60 {strides = array<i32>} : memref<8x128xf32, #tpu.memory_space<vmem>>, vector<8x128xf32>,
    return
  }
  func.func @transform_0(%arg0: i32) -> (i32, i32, i32) {
    %c0_i32 = arith.constant 0 : i32
    %c0_i32_0 = arith.constant 0 : i32
    %c0_i32_1 = arith.constant 0 : i32
    return %arg0, %c0_i32, %c0_i32_0 : i32, i32, i32
  }
  func.func @transform_1(%arg0: i32) -> (i32, i32, i32) {
    %c0_i32 = arith.constant 0 : i32
    %c0_i32_0 = arith.constant 0 : i32
    %c0_i32_1 = arith.constant 0 : i32
    return %arg0, %c0_i32, %c0_i32_0 : i32, i32, i32
  }
  func.func @transform_2(%arg0: i32) -> (i32, i32) {
    %c0_i32 = arith.constant 0 : i32
    %c0_i32_0 = arith.constant 0 : i32
    return %arg0, %c0_i32 : i32, i32
  }
  func.func @transform_3(%arg0: i32) -> (i32, i32) {
    %c0_i32 = arith.constant 0 : i32
    %c0_i32_0 = arith.constant 0 : i32
    %c0_i32_1 = arith.constant 0 : i32
    return %c0_i32, %c0_i32_0 : i32, i32
  }
  func.func @transform_4(%arg0: i32) -> (i32, i32) {
    %c0_i32 = arith.constant 0 : i32
    %c0_i32_0 = arith.constant 0 : i32
    %c0_i32_1 = arith.constant 0 : i32
    return %c0_i32, %c0_i32_0 : i32, i32
  }
  func.func @transform_5(%arg0: i32) -> (i32, i32) {
    %c0_i32 = arith.constant 0 : i32
    %c0_i32_0 = arith.constant 0 : i32
    %c0_i32_1 = arith.constant 0 : i32
    return %c0_i32, %c0_i32_0 : i32, i32
  }
  func.func @transform_6(%arg0: i32) -> (i32, i32) {
    %c0_i32 = arith.constant 0 : i32
    %c0_i32_0 = arith.constant 0 : i32
    %c0_i32_1 = arith.constant 0 : i32
    return %c0_i32, %c0_i32_0 : i32, i32
  }
  func.func @transform_7(%arg0: i32) -> (i32, i32) {
    %c0_i32 = arith.constant 0 : i32
    %c0_i32_0 = arith.constant 0 : i32
    %c0_i32_1 = arith.constant 0 : i32
    return %c0_i32, %c0_i32_0 : i32, i32
  }
  func.func @transform_8(%arg0: i32) -> (i32, i32) {
    %c0_i32 = arith.constant 0 : i32
    %c0_i32_0 = arith.constant 0 : i32
    return %arg0, %c0_i32 : i32, i32
  }
}

</mosaic_0001>

<bundles_post_ra>
// kernel: equiformer_block_forward.2
= control target key start
LH: loop header
LB: loop body
LE: loop exit
PB: predicated region body
PF: predicated region fallthrough
CT: control target
= control target key end

     0   :  { %s1338_s27 = smov 0   ;;  %s1611_s0 = inlined_call_operand.vmem [shape: f32[64,128], index: 0, kind: input, shape index: {}]   ;;  %s1612_s1 = inlined_call_operand.vmem [shape: bf16[128,64], index: 1, kind: input, shape index: {}]   ;;  %s1613_s2 = inlined_call_operand.vmem [shape: bf16[16,32], index: 2, kind: input, shape index: {}]   ;;  %s1614_s3 = inlined_call_operand.vmem [shape: bf16[32,64], index: 3, kind: input, shape index: {}]   ;;  %s1615_s4 = inlined_call_operand.vmem [shape: bf16[32,32], index: 4, kind: input, shape index: {}]   ;;  %s1616_s5 = inlined_call_operand.vmem [shape: bf16[32,32], index: 5, kind: input, shape index: {}]   ;;  %s1617_s6 = inlined_call_operand.vmem [shape: f32[8,128], index: 6, kind: input, shape index: {}]   ;;  %s1618_s7 = inlined_call_operand.vmem [shape: bf16[64,32], index: 7, kind: output, shape index: {0}]   ;;  %s1619_s8 = inlined_call_operand.vmem [shape: bf16[64,32], index: 8, kind: output, shape index: {1}]  }
   0x1 LB: > { %s1117_s28 = sadd.s32 4294967295, %s1287_s27   ;;  %p1121_p0 = scmp.ge.s32.totalorder %s1287_s27, 1  ;;  %s1287_s27 = sphi %s1338_s27, %s19_s27  }
   0x2   : > { %p266_p1 = scmp.lt.s32.totalorder %s1287_s27, 3 }
   0x4   : > { %p267_p2 = pnand %p1121_p0, %p266_p1 }
   0x5   : > { %s1122_s13 = sshll.u32 (!%p267_p2), %s1117_s28, 2  ;;  %s1289_s10 = smov (!%p267_p2), 96  }
   0x6   : > { %270 = sbr.rel (%p267_p2) target bundleno = 1405 (0x57d), region = 48  ;;  %p306_p3 = scmp.lt.s32.totalorder (!%p267_p2), %s1122_s13, 7 }
   0x7   : > { %s1291_s11 = smov (!%p267_p2), 32   ;;  %s1292_s12 = smov (!%p267_p2), 64  }
   0x8   : > { %s1208_s30 = sshll.u32 (!%p267_p2), %s1117_s28, 5 }
   0xb   : > { %v1218_v0 = vld [vmem:[%s1612_s1 + $0x38] sm:$0xff]  ;;  %v1217_v1 = vld [vmem:[%s1612_s1 + $0x30] sm:$0xff]  ;;  %v1216_v2 = vld [vmem:[%s1612_s1 + $0x28] sm:$0xff]  ;;  %s1623_s13 = smov (!%p306_p3, %s1122_s13), 7  ;;  %vm431_vm0 = vcmask 130048   ;;  %v1290_v32 = vmov 16.0  }
   0xc   : > { %396 = vmatpush.bf16.msra.mxu0 %v1218_v0  ;;  %v1215_v3 = vld [vmem:[%s1612_s1 + $0x20] sm:$0xff]  ;;  %v1214_v4 = vld [vmem:[%s1612_s1 + $0x18] sm:$0xff]  ;;  %v1213_v5 = vld [vmem:[%s1612_s1 + $0x10] sm:$0xff]  ;;  %s1123_s20 = sshll.u32 %s1623_s13, 3  ;;  %1239 = vrcp.f32 %v1290_v32  ;;  %s1125_s9 = sshll.u32 %s1623_s13, 2 }
   0xd   : > { %v1212_v6 = vld [vmem:[%s1612_s1 + $0x8] sm:$0xff]  ;;  %s309_s25 = scalar_lea.vmem %s1611_s0, %s1123_s20  ;;  %v1211_v7 = vld [vmem:[%s1612_s1] sm:$0xff]  ;;  %s321_s15 = scalar_lea.vmem %s1619_s8, %s1125_s9 }
   0xe   : > { %v1378_v8 = vld [vmem:[%s309_s25] sm:$0xff]  ;;  %v1380_v9 = vld [vmem:[%s309_s25 + $0x8] sm:$0xff]  ;;  %v1384_v11 = vld [vmem:[%s309_s25 + $0x10] sm:$0xff] }
   0xf   : > { %v345_v10 = vpack.c.bf16 %v1380_v9, %v1378_v8  ;;  %v1386_v12 = vld [vmem:[%s309_s25 + $0x18] sm:$0xff]  ;;  %v1393_v14 = vld [vmem:[%s1617_s6] sm:$0xff] }
  0x10   : > { %397 = vmatpush.bf16.msra.mxu0 %v1217_v1  ;;  %v346_v13 = vpack.c.bf16 %v1386_v12, %v1384_v11  ;;  %v347_v15 = vperm.slane %v1393_v14, 0  ;;  %v543_v63 = vperm.slane %v1393_v14, 1  ;;  %v552_v0 = vperm.slane %v1393_v14, 2 }
  0x12   : > { %v1240_v33 = vpop.eup %1239 }
  0x13   : > { %v445_v34 = vmul.f32 16.0, %v1240_v33  ;;  %vm449_vm1 = vweird.f32 %v1240_v33 }
  0x14   : > { %398 = vmatpush.bf16.msra.mxu0 %v1216_v2 }
  0x15   : > { %v446_v35 = vsub.f32 1.0, %v445_v34 }
  0x17   : > { %v447_v36 = vmul.f32 %v1240_v33, %v446_v35 }
  0x18   : > { %399 = vmatpush.bf16.msra.mxu0 %v1215_v3 }
  0x19   : > { %v448_v37 = vadd.f32 %v1240_v33, %v447_v36 }
  0x1b   : > { %v450_v38 = vsel %vm449_vm1, %v1240_v33, %v448_v37 }
  0x1c   : > { %400 = vmatpush.bf16.msra.mxu0 %v1214_v4 }
  0x20   : > { %401 = vmatpush.bf16.msra.mxu0 %v1213_v5 }
  0x24   : > { %402 = vmatpush.bf16.msra.mxu0 %v1212_v6 }
  0x28   : > { %403 = vmatpush.bf16.msra.mxu0 %v1211_v7 }
  0x2b   : > { %404 = vmatmul.bf16.vlgmr.msra.gmra.mxu0 %v345_v10 }
  0x3b   : > { %409 = vmatmul.bf16.gmra.mxu0 %v346_v13 }
  0xa8   : > { %v405_v16 = vpop.f32.mrf.mxu0 }
  0xa9   : > { %v1396_v17 = vadd.f32 %v405_v16, %v347_v15 }
  0xab   : > { %419 = vrot.lane.b32.xlu0 %v1396_v17, %s1289_s10 }
  0xb0   : > { %v407_v18 = vpop.f32.mrf.mxu0 }
  0xb1   : > { %v1400_v19 = vadd.f32 %v407_v18, %v347_v15 }
  0xb3   : > { %421 = vrot.lane.b32.xlu0 %v1400_v19, %s1289_s10 }
  0xb8   : > { %v410_v20 = vpop.f32.mrf.mxu0 }
  0xb9   : > { %v1404_v21 = vadd.f32 %v410_v20, %v347_v15 }
  0xbb   : > { %423 = vrot.lane.b32.xlu1 %v1404_v21, %s1289_s10 }
  0xc0   : > { %v412_v22 = vpop.f32.mrf.mxu0 }
  0xc1   : > { %v1408_v23 = vadd.f32 %v412_v22, %v347_v15 }
  0xc3   : > { %425 = vrot.lane.b32.xlu1 %v1408_v23, %s1289_s10 }
 0x11d   : > { %v420_v24 = vpop.permute.xlu0 %419 }
 0x11e   : > { %v432_v25 = vsel %vm431_vm0, %v420_v24, 0.0 }
 0x11f   : > { %433 = vadd.xlane.f32.xlu2 %v432_v25 }
 0x125   : > { %v422_v26 = vpop.permute.xlu0 %421 }
 0x126   : > { %v435_v27 = vsel %vm431_vm0, %v422_v26, 0.0 }
 0x127   : > { %436 = vadd.xlane.f32.xlu2 %v435_v27 }
 0x12d   : > { %v424_v28 = vpop.permute.xlu1 %423 }
 0x12e   : > { %v438_v29 = vsel %vm431_vm0, %v424_v28, 0.0 }
 0x12f   : > { %439 = vadd.xlane.f32.xlu0 %v438_v29 }
 0x135   : > { %v426_v30 = vpop.permute.xlu1 %425 }
 0x136   : > { %v441_v31 = vsel %vm431_vm0, %v426_v30, 0.0 }
 0x137   : > { %442 = vadd.xlane.f32.xlu1 %v441_v31 }
 0x192   : > { %v434_v39 = vpop.xlane.xlu2 %433 }
 0x193   : > { %v451_v40 = vmul.f32 %v450_v38, %v434_v39 }
 0x195   : > { %v1417_v41 = vsub.f32 %v1396_v17, %v451_v40 }
 0x197   : > { %v459_v42 = vmul.f32 %v1417_v41, %v1417_v41 }
 0x199   : > { %467 = vrot.lane.b32.xlu2 %v459_v42, %s1289_s10 }
 0x19a   : > { %v437_v43 = vpop.xlane.xlu2 %436 }
 0x19b   : > { %v452_v44 = vmul.f32 %v450_v38, %v437_v43 }
 0x19d   : > { %v1423_v45 = vsub.f32 %v1400_v19, %v452_v44 }
 0x19f   : > { %v460_v46 = vmul.f32 %v1423_v45, %v1423_v45 }
 0x1a1   : > { %469 = vrot.lane.b32.xlu2 %v460_v46, %s1289_s10 }
 0x1a2   : > { %v440_v47 = vpop.xlane.xlu0 %439 }
 0x1a3   : > { %v453_v48 = vmul.f32 %v450_v38, %v440_v47 }
 0x1a5   : > { %v1429_v49 = vsub.f32 %v1404_v21, %v453_v48 }
 0x1a7   : > { %v461_v50 = vmul.f32 %v1429_v49, %v1429_v49 }
 0x1a9   : > { %471 = vrot.lane.b32.xlu2 %v461_v50, %s1289_s10 }
 0x1aa   : > { %v443_v51 = vpop.xlane.xlu1 %442 }
 0x1ab   : > { %v454_v52 = vmul.f32 %v450_v38, %v443_v51 }
 0x1ad   : > { %v1435_v53 = vsub.f32 %v1408_v23, %v454_v52 }
 0x1af   : > { %v462_v54 = vmul.f32 %v1435_v53, %v1435_v53 }
 0x1b1   : > { %473 = vrot.lane.b32.xlu2 %v462_v54, %s1289_s10 }
 0x1f3   : > { %v468_v55 = vpop.permute.xlu2 %467 }
 0x1f4   : > { %v479_v56 = vsel %vm431_vm0, %v468_v55, 0.0 }
 0x1f5   : > { %480 = vadd.xlane.f32.xlu0 %v479_v56 }
 0x1fb   : > { %v470_v57 = vpop.permute.xlu2 %469 }
 0x1fc   : > { %v482_v58 = vsel %vm431_vm0, %v470_v57, 0.0 }
 0x1fd   : > { %483 = vadd.xlane.f32.xlu1 %v482_v58 }
 0x203   : > { %v472_v59 = vpop.permute.xlu2 %471 }
 0x204   : > { %v485_v60 = vsel %vm431_vm0, %v472_v59, 0.0 }
 0x205   : > { %486 = vadd.xlane.f32.xlu2 %v485_v60 }
 0x20b   : > { %v474_v61 = vpop.permute.xlu2 %473 }
 0x20c   : > { %v488_v62 = vsel %vm431_vm0, %v474_v61, 0.0 }
 0x20d   : > { %489 = vadd.xlane.f32.xlu0 %v488_v62 }
 0x216   : > { %545 = vrot.lane.b32.xlu1 %v543_v63, %s1291_s11 }
 0x21d   : > { %691 = vrot.lane.b32.xlu2 %v1384_v11, %s1292_s12 }
 0x221   : > { %554 = vrot.lane.b32.xlu0 %v552_v0, %s1291_s11 }
 0x268   : > { %v481_v1 = vpop.xlane.xlu0 %480 }
 0x269   : > { %v491_v2 = vmul.f32 %v481_v1, %v450_v38 }
 0x26b   : > { %v495_v3 = vadd.f32 1e-05, %v491_v2 }
 0x26d   : > { %1241 = vrsqrt.f32 %v495_v3  ;;  %vm505_vm7 = vweird.f32 %v495_v3 }
 0x270   : > { %v484_v4 = vpop.xlane.xlu1 %483 }
 0x271   : > { %v492_v5 = vmul.f32 %v484_v4, %v450_v38 }
 0x273   : > { %v496_v6 = vadd.f32 1e-05, %v492_v5  ;;  %v1242_v7 = vpop.eup %1241 }
 0x274   : > { %v500_v13 = vmul.f32 %v1242_v7, %v495_v3  ;;  %vm506_vm3 = vweird.f32 %v1242_v7 }
 0x275   : > { %1243 = vrsqrt.f32 %v496_v6  ;;  %vm515_vm4 = vweird.f32 %v496_v6  ;;  %vm507_vm8 = vmor %vm505_vm7, %vm506_vm3 }
 0x276   : > { %v501_v22 = vmul.f32 %v1242_v7, %v500_v13 }
 0x278   : > { %v487_v10 = vpop.xlane.xlu2 %486  ;;  %v502_v27 = vmul.f32 0.5, %v501_v22 }
 0x279   : > { %v493_v15 = vmul.f32 %v487_v10, %v450_v38 }
 0x27a   : > { %v503_v33 = vsub.f32 1.5, %v502_v27 }
 0x27b   : > { %v1244_v16 = vpop.eup %1243  ;;  %v497_v18 = vadd.f32 1e-05, %v493_v15 }
 0x27c   : > { %v510_v20 = vmul.f32 %v1244_v16, %v496_v6  ;;  %vm516_vm2 = vweird.f32 %v1244_v16  ;;  %v504_v37 = vmul.f32 %v1242_v7, %v503_v33 }
 0x27d   : > { %1245 = vrsqrt.f32 %v497_v18  ;;  %vm517_vm5 = vmor %vm515_vm4, %vm516_vm2  ;;  %vm525_vm9 = vweird.f32 %v497_v18 }
 0x27e   : > { %v511_v24 = vmul.f32 %v1244_v16, %v510_v20  ;;  %v508_v44 = vsel %vm507_vm8, %v1242_v7, %v504_v37  ;;  %v1219_v20 = vld [vmem:[%s1613_s2] sm:$0xff] }
 0x27f   : > { %v539_v54 = vmul.f32 %v508_v44, %v1417_v41  ;;  %671 = vmatpush.bf16.msra.mxu1 %v1219_v20  ;;  %1226 = vmatpush.bf16.msra.mxu2 %v1219_v20 }
 0x280   : > { %v512_v25 = vmul.f32 0.5, %v511_v24  ;;  %v490_v26 = vpop.xlane.xlu0 %489 }
 0x281   : > { %v494_v28 = vmul.f32 %v490_v26, %v450_v38 }
 0x282   : > { %v513_v30 = vsub.f32 1.5, %v512_v25 }
 0x283   : > { %v1246_v29 = vpop.eup %1245  ;;  %v498_v31 = vadd.f32 1e-05, %v494_v28 }
 0x284   : > { %v520_v32 = vmul.f32 %v1246_v29, %v497_v18  ;;  %v514_v35 = vmul.f32 %v1244_v16, %v513_v30  ;;  %vm526_vm6 = vweird.f32 %v1246_v29 }
 0x285   : > { %1247 = vrsqrt.f32 %v498_v31  ;;  %vm527_vm10 = vmor %vm525_vm9, %vm526_vm6  ;;  %vm535_vm12 = vweird.f32 %v498_v31 }
 0x286   : > { %v521_v34 = vmul.f32 %v1246_v29, %v520_v32  ;;  %v518_v42 = vsel %vm517_vm5, %v1244_v16, %v514_v35 }
 0x287   : > { %v540_v47 = vmul.f32 %v518_v42, %v1423_v45 }
 0x288   : > { %v522_v36 = vmul.f32 0.5, %v521_v34  ;;  %v546_v50 = vpop.permute.xlu1 %545 }
 0x289   : > { %v548_v57 = vmul.f32 %v546_v50, %v539_v54  ;;  %v549_v58 = vmul.f32 %v546_v50, %v540_v47 }
 0x28a   : > { %v523_v39 = vsub.f32 1.5, %v522_v36 }
 0x28b   : > { %v1248_v40 = vpop.eup %1247 }
 0x28c   : > { %v524_v38 = vmul.f32 %v1246_v29, %v523_v39  ;;  %v530_v43 = vmul.f32 %v1248_v40, %v498_v31  ;;  %vm536_vm11 = vweird.f32 %v1248_v40 }
 0x28d   : > { %vm537_vm13 = vmor %vm535_vm12, %vm536_vm11 }
 0x28e   : > { %v531_v46 = vmul.f32 %v1248_v40, %v530_v43  ;;  %v528_v48 = vsel %vm527_vm10, %v1246_v29, %v524_v38 }
 0x28f   : > { %v541_v51 = vmul.f32 %v528_v48, %v1429_v49 }
 0x290   : > { %v532_v52 = vmul.f32 0.5, %v531_v46 }
 0x291   : > { %v550_v55 = vmul.f32 %v546_v50, %v541_v51 }
 0x292   : > { %v533_v56 = vsub.f32 1.5, %v532_v52 }
 0x293   : > { %v555_v59 = vpop.permute.xlu0 %554 }
 0x294   : > { %v534_v60 = vmul.f32 %v1248_v40, %v533_v56  ;;  %v1453_v61 = vadd.f32 %v555_v59, %v548_v57  ;;  %v1455_v62 = vadd.f32 %v555_v59, %v549_v58  ;;  %v1457_v45 = vadd.f32 %v555_v59, %v550_v55 }
 0x296   : > { %v538_v63 = vsel %vm537_vm13, %v1248_v40, %v534_v60  ;;  %v1160_v49 = vmul.f32 -1.442695, %v1453_v61  ;;  %v1161_v41 = vmul.f32 -1.442695, %v1455_v62  ;;  %v1162_v0 = vmul.f32 -1.442695, %v1457_v45 }
 0x297   : > { %v542_v1 = vmul.f32 %v538_v63, %v1435_v53 }
 0x298   : > { %1249 = vpow2.f32 %v1160_v49 }
 0x299   : > { %v551_v2 = vmul.f32 %v546_v50, %v542_v1  ;;  %1251 = vpow2.f32 %v1161_v41 }
 0x29a   : > { %1253 = vpow2.f32 %v1162_v0 }
 0x29b   : > { %v1463_v3 = vadd.f32 %v555_v59, %v551_v2 }
 0x29d   : > { %v1163_v4 = vmul.f32 -1.442695, %v1463_v3 }
 0x29e   : > { %v1250_v5 = vpop.eup %1249 }
 0x29f   : > { %v1252_v6 = vpop.eup %1251  ;;  %1255 = vpow2.f32 %v1163_v4  ;;  %v573_v7 = vadd.f32 1.0, %v1250_v5 }
 0x2a0   : > { %v1254_v10 = vpop.eup %1253  ;;  %v574_v13 = vadd.f32 1.0, %v1252_v6 }
 0x2a1   : > { %v575_v15 = vadd.f32 1.0, %v1254_v10  ;;  %1257 = vrcp.f32 %v573_v7  ;;  %v586_v26 = vand.u32 2147483647, %v573_v7  ;;  %v588_v29 = vand.u32 2147483648, %v573_v7 }
 0x2a2   : > { %1259 = vrcp.f32 %v574_v13  ;;  %vm582_vm14 = vweird.f32 %v573_v7  ;;  %v601_v32 = vand.u32 2147483647, %v574_v13  ;;  %v603_v34 = vand.u32 2147483648, %v574_v13 }
 0x2a3   : > { %1261 = vrcp.f32 %v575_v15  ;;  %vm1472_vm1 = vcmp.eq.f32.partialorder %v586_v26, 8.507059e+37  ;;  %vm597_vm2 = vweird.f32 %v574_v13  ;;  %v589_v42 = vor.u32 1.1754944e-38, %v588_v29 }
 0x2a4   : > { %vm612_vm4 = vweird.f32 %v575_v15  ;;  %vm602_vm6 = vcmp.eq.f32.partialorder %v601_v32, 8.507059e+37  ;;  %v604_v47 = vor.u32 1.1754944e-38, %v603_v34  ;;  %v618_v50 = vand.u32 2147483648, %v575_v15  ;;  %v692_v32 = vpop.permute.xlu2 %691 }
 0x2a5   : > { %v1256_v16 = vpop.eup %1255  ;;  %v616_v54 = vand.u32 2147483647, %v575_v15 }
 0x2a6   : > { %v1466_v53 = vadd.f32 1.0, %v1256_v16  ;;  %v619_v41 = vor.u32 1.1754944e-38, %v618_v50 }
 0x2a7   : > { %v1258_v18 = vpop.eup %1257  ;;  %vm617_vm11 = vcmp.eq.f32.partialorder %v616_v54, 8.507059e+37 }
 0x2a8   : > { %v1260_v22 = vpop.eup %1259  ;;  %1263 = vrcp.f32 %v1466_v53  ;;  %v578_v24 = vmul.f32 %v1258_v18, %v573_v7  ;;  %vm583_vm15 = vweird.f32 %v1258_v18  ;;  %v631_v58 = vand.u32 2147483647, %v1466_v53 }
 0x2a9   : > { %v1262_v25 = vpop.eup %1261  ;;  %v593_v27 = vmul.f32 %v1260_v22, %v574_v13  ;;  %vm598_vm3 = vweird.f32 %v1260_v22  ;;  %vm584_vm5 = vmor %vm582_vm14, %vm583_vm15  ;;  %v633_v59 = vand.u32 2147483648, %v1466_v53  ;;  %vm627_vm12 = vweird.f32 %v1466_v53 }
 0x2aa   : > { %v579_v28 = vsub.f32 1.0, %v578_v24  ;;  %v608_v30 = vmul.f32 %v1262_v25, %v575_v15  ;;  %vm613_vm7 = vweird.f32 %v1262_v25  ;;  %vm599_vm8 = vmor %vm597_vm2, %vm598_vm3  ;;  %vm632_vm14 = vcmp.eq.f32.partialorder %v631_v58, 8.507059e+37 }
 0x2ab   : > { %v594_v31 = vsub.f32 1.0, %v593_v27  ;;  %vm614_vm9 = vmor %vm612_vm4, %vm613_vm7 }
 0x2ac   : > { %v580_v33 = vmul.f32 %v1258_v18, %v579_v28  ;;  %v609_v35 = vsub.f32 1.0, %v608_v30 }
 0x2ad   : > { %v595_v37 = vmul.f32 %v1260_v22, %v594_v31 }
 0x2ae   : > { %v1264_v39 = vpop.eup %1263  ;;  %v581_v40 = vadd.f32 %v1258_v18, %v580_v33  ;;  %v610_v38 = vmul.f32 %v1262_v25, %v609_v35 }
 0x2af   : > { %v596_v43 = vadd.f32 %v1260_v22, %v595_v37  ;;  %v623_v44 = vmul.f32 %v1264_v39, %v1466_v53  ;;  %vm628_vm10 = vweird.f32 %v1264_v39 }
 0x2b0   : > { %v585_v46 = vsel %vm584_vm5, %v1258_v18, %v581_v40  ;;  %v611_v48 = vadd.f32 %v1262_v25, %v610_v38  ;;  %vm629_vm13 = vmor %vm627_vm12, %vm628_vm10 }
 0x2b1   : > { %v590_v51 = vsel %vm1472_vm1, %v589_v42, %v585_v46  ;;  %v600_v52 = vsel %vm599_vm8, %v1260_v22, %v596_v43  ;;  %v624_v55 = vsub.f32 1.0, %v623_v44  ;;  %v1225_v44 = vld [vmem:[%s1616_s5 + $0x8] sm:$0xff]  ;;  %v1224_v46 = vld [vmem:[%s1616_s5] sm:$0xff] }
 0x2b2   : > { %v605_v56 = vsel %vm602_vm6, %v604_v47, %v600_v52  ;;  %v637_v57 = vmul.f32 %v590_v51, %v1453_v61  ;;  %v615_v63 = vsel %vm614_vm9, %v1262_v25, %v611_v48  ;;  %v634_v61 = vor.u32 1.1754944e-38, %v633_v59  ;;  %966 = vmatpush.bf16.msrb.mxu1 %v1225_v44 }
 0x2b3   : > { %v638_v60 = vmul.f32 %v605_v56, %v1455_v62  ;;  %v625_v49 = vmul.f32 %v1264_v39, %v624_v55  ;;  %v620_v2 = vsel %vm617_vm11, %v619_v41, %v615_v63 }
 0x2b4   : > { %v639_v6 = vmul.f32 %v620_v2, %v1457_v45  ;;  %v1221_v45 = vld [vmem:[%s1614_s3 + $0x8] sm:$0xff] }
 0x2b5   : > { %v643_v0 = vpack.c.bf16 %v638_v60, %v637_v57  ;;  %v626_v1 = vadd.f32 %v1264_v39, %v625_v49  ;;  %739 = vmatpush.bf16.msrb.mxu2 %v1221_v45 }
 0x2b6   : > { %967 = vmatpush.bf16.msrb.mxu1 %v1224_v46 }
 0x2b7   : > { %648 = vrot.lane.b32.xlu1 %v643_v0, %s1289_s10  ;;  %v630_v4 = vsel %vm629_vm13, %v1264_v39, %v626_v1 }
 0x2b8   : > { %v635_v5 = vsel %vm632_vm14, %v634_v61, %v630_v4 }
 0x2b9   : > { %v640_v62 = vmul.f32 %v635_v5, %v1463_v3 }
 0x2bb   : > { %v644_v7 = vpack.c.bf16 %v640_v62, %v639_v6 }
 0x2bd   : > { %650 = vrot.lane.b32.xlu0 %v644_v7, %s1289_s10 }
 0x2bf   : > { %687 = vrot.lane.b32.xlu1 %v1378_v8, %s1292_s12 }
 0x2c5   : > { %689 = vrot.lane.b32.xlu0 %v1380_v9, %s1292_s12 }
 0x2c7   : > { %693 = vrot.lane.b32.xlu1 %v1386_v12, %s1292_s12  ;;  %s315_s12 = scalar_lea.vmem %s1618_s7, %s1125_s9 }
 0x2cd   : > { %861 = vrot.lane.b32.xlu0 %v1378_v8, %s1289_s10  ;;  %v1220_v8 = vld [vmem:[%s1614_s3] sm:$0xff] }
 0x2ce   : > { %740 = vmatpush.bf16.msrb.mxu2 %v1220_v8 }
 0x2cf   : > { %863 = vrot.lane.b32.xlu1 %v1380_v9, %s1289_s10  ;;  %v877_v9 = vperm.slane %v1393_v14, 5 }
 0x2d5   : > { %879 = vrot.lane.b32.xlu0 %v877_v9, %s1291_s11 }
 0x2d7   : > { %865 = vrot.lane.b32.xlu1 %v1384_v11, %s1289_s10  ;;  %v645_v11 = vperm.slane %v1393_v14, 3 }
 0x2dd   : > { %867 = vrot.lane.b32.xlu0 %v1386_v12, %s1289_s10  ;;  %v713_v12 = vperm.slane %v1393_v14, 4 }
 0x329   : > { %v649_v3 = vpop.permute.xlu1 %648 }
 0x32a   : > { %1168 = vmatmul.msk.bf16.vlgmr.msra.gmra.mxu1 %vm431_vm0, %v649_v3 }
 0x32f   : > { %v651_v10 = vpop.permute.xlu0 %650 }
 0x330   : > { %1169 = vmatmul.msk.bf16.vlgmr.msra.gmra.mxu2 %vm431_vm0, %v651_v10  ;;  %vm726_vm0 = vcmask 261120  }
 0x331   : > { %v688_v15 = vpop.permute.xlu1 %687 }
 0x332   : > { %v699_v20 = vmul.f32 %v688_v15, %v1396_v17 }
 0x337   : > { %v690_v16 = vpop.permute.xlu0 %689 }
 0x338   : > { %v700_v22 = vmul.f32 %v690_v16, %v1400_v19  ;;  %v701_v19 = vmul.f32 %v692_v32, %v1404_v21  ;;  %v1223_v16 = vld [vmem:[%s1615_s4 + $0x8] sm:$0xff] }
 0x339   : > { %v694_v29 = vpop.permute.xlu1 %693  ;;  %923 = vmatpush.bf16.msra.mxu3 %v1223_v16 }
 0x33a   : > { %v702_v33 = vmul.f32 %v694_v29, %v1408_v23 }
 0x33f   : > { %v862_v4 = vpop.permute.xlu0 %861 }
 0x347   : > { %v1552_v32 = vpop.permute.xlu0 %879 }
 0x3a7   : > { %v673_v13 = vpop.f32.mrf.mxu1 }
 0x3a8   : > { %v674_v53 = vadd.f32 %v673_v13, %v645_v11 }
 0x3aa   : > { %v703_v25 = vmul.f32 %v699_v20, %v674_v53 }
 0x3af   : > { %v675_v18 = vpop.f32.mrf.mxu1 }
 0x3b0   : > { %v676_v24 = vadd.f32 %v675_v18, %v645_v11 }
 0x3b2   : > { %v704_v26 = vmul.f32 %v700_v22, %v676_v24 }
 0x3b3   : > { %v678_v27 = vpop.f32.mrf.mxu2 }
 0x3b4   : > { %v711_v28 = vpack.c.bf16 %v704_v26, %v703_v25  ;;  %v679_v17 = vadd.f32 %v678_v27, %v645_v11  ;;  %v1222_v26 = vld [vmem:[%s1615_s4] sm:$0xff] }
 0x3b5   : > { %924 = vmatpush.bf16.msra.mxu3 %v1222_v26 }
 0x3b6   : > { %1178 = vmatmul.msk.bf16.vlgmr.msrb.gmra.mxu2 %vm726_vm0, %v711_v28  ;;  %v705_v35 = vmul.f32 %v701_v19, %v679_v17 }
 0x3bb   : > { %v680_v30 = vpop.f32.mrf.mxu2 }
 0x3bc   : > { %v681_v31 = vadd.f32 %v680_v30, %v645_v11  ;;  %v864_v30 = vpop.permute.xlu1 %863 }
 0x3be   : > { %v706_v34 = vmul.f32 %v702_v33, %v681_v31 }
 0x3c0   : > { %v712_v36 = vpack.c.bf16 %v706_v34, %v705_v35 }
 0x3c6   : > { %1179 = vmatmul.msk.bf16.gmra.mxu2 %vm726_vm0, %v712_v36 }
 0x439   : > { %v742_v37 = vpop.f32.mrf.mxu2 }
 0x43a   : > { %v1522_v39 = vadd.f32 %v742_v37, %v713_v12 }
 0x43c   : > { %v1180_v40 = vmul.f32 -1.442695, %v1522_v39  ;;  %v756_v22 = vmul.f32 0.4, %v1522_v39  ;;  %v752_v27 = vmul.f32 0.6, %v1522_v39 }
 0x43e   : > { %1265 = vpow2.f32 %v1180_v40 }
 0x441   : > { %v744_v42 = vpop.f32.mrf.mxu2 }
 0x442   : > { %v1525_v38 = vadd.f32 %v744_v42, %v713_v12 }
 0x444   : > { %v1266_v23 = vpop.eup %1265  ;;  %v1181_v43 = vmul.f32 -1.442695, %v1525_v38  ;;  %v757_v34 = vmul.f32 0.4, %v1525_v38 }
 0x445   : > { %v772_v21 = vadd.f32 1.0, %v1266_v23  ;;  %v852_v23 = vperm.slane %v1393_v14, 7 }
 0x446   : > { %1267 = vpow2.f32 %v1181_v43 }
 0x447   : > { %1269 = vrcp.f32 %v772_v21  ;;  %v787_v58 = vand.u32 2147483648, %v772_v21  ;;  %v785_v63 = vand.u32 2147483647, %v772_v21  ;;  %vm781_vm1 = vweird.f32 %v772_v21 }
 0x449   : > { %v747_v47 = vpop.f32.mrf.mxu2  ;;  %v788_v61 = vor.u32 1.1754944e-38, %v787_v58  ;;  %vm786_vm3 = vcmp.eq.f32.partialorder %v785_v63, 8.507059e+37 }
 0x44a   : > { %v1534_v48 = vadd.f32 %v747_v47, %v713_v12 }
 0x44c   : > { %v1268_v50 = vpop.eup %1267  ;;  %v1182_v51 = vmul.f32 -1.442695, %v1534_v48 }
 0x44d   : > { %v1270_v52 = vpop.eup %1269  ;;  %v773_v54 = vadd.f32 1.0, %v1268_v50 }
 0x44e   : > { %1271 = vpow2.f32 %v1182_v51  ;;  %v777_v55 = vmul.f32 %v1270_v52, %v772_v21  ;;  %vm782_vm15 = vweird.f32 %v1270_v52 }
 0x44f   : > { %1273 = vrcp.f32 %v773_v54  ;;  %vm783_vm2 = vmor %vm781_vm1, %vm782_vm15  ;;  %v802_v3 = vand.u32 2147483648, %v773_v54  ;;  %v800_v8 = vand.u32 2147483647, %v773_v54  ;;  %vm796_vm5 = vweird.f32 %v773_v54 }
 0x450   : > { %v778_v56 = vsub.f32 1.0, %v777_v55 }
 0x451   : > { %v749_v57 = vpop.f32.mrf.mxu2  ;;  %v803_v20 = vor.u32 1.1754944e-38, %v802_v3  ;;  %vm801_vm7 = vcmp.eq.f32.partialorder %v800_v8, 8.507059e+37 }
 0x452   : > { %v1537_v59 = vadd.f32 %v749_v57, %v713_v12  ;;  %v779_v60 = vmul.f32 %v1270_v52, %v778_v56 }
 0x454   : > { %v1272_v49 = vpop.eup %1271  ;;  %v1183_v41 = vmul.f32 -1.442695, %v1537_v59  ;;  %v780_v0 = vadd.f32 %v1270_v52, %v779_v60 }
 0x455   : > { %v1274_v1 = vpop.eup %1273  ;;  %v774_v2 = vadd.f32 1.0, %v1272_v49 }
 0x456   : > { %1275 = vpow2.f32 %v1183_v41  ;;  %v784_v5 = vsel %vm783_vm2, %v1270_v52, %v780_v0  ;;  %v792_v6 = vmul.f32 %v1274_v1, %v773_v54  ;;  %vm797_vm4 = vweird.f32 %v1274_v1 }
 0x457   : > { %1277 = vrcp.f32 %v774_v2  ;;  %v789_v62 = vsel %vm786_vm3, %v788_v61, %v784_v5  ;;  %vm798_vm6 = vmor %vm796_vm5, %vm797_vm4  ;;  %v815_v35 = vand.u32 2147483647, %v774_v2  ;;  %v817_v36 = vand.u32 2147483648, %v774_v2 }
 0x458   : > { %v836_v7 = vmul.f32 2.0, %v789_v62  ;;  %v793_v45 = vsub.f32 1.0, %v792_v6  ;;  %v857_v9 = vmul.f32 %v789_v62, %v1522_v39  ;;  %v753_v39 = vmul.f32 0.6, %v1525_v38 }
 0x459   : > { %vm811_vm9 = vweird.f32 %v774_v2  ;;  %vm816_vm11 = vcmp.eq.f32.partialorder %v815_v35, 8.507059e+37  ;;  %v818_v50 = vor.u32 1.1754944e-38, %v817_v36  ;;  %v758_v6 = vmul.f32 0.4, %v1534_v48 }
 0x45a   : > { %v794_v10 = vmul.f32 %v1274_v1, %v793_v45  ;;  %v1184_v11 = vadd.f32 -1.0, %v836_v7  ;;  %v873_v28 = vmul.f32 %v862_v4, %v857_v9  ;;  %v866_v4 = vpop.permute.xlu1 %865  ;;  %v868_v7 = vpop.permute.xlu0 %867  ;;  %vm1010_vm2 = vcmask 257024  }
 0x45c   : > { %v1276_v13 = vpop.eup %1275  ;;  %v795_v15 = vadd.f32 %v1274_v1, %v794_v10  ;;  %v844_v31 = vmul.f32 %v1184_v11, %v756_v22  ;;  %v882_v42 = vmul.f32 %v1552_v32, %v873_v28  ;;  %v759_v11 = vmul.f32 0.4, %v1537_v59 }
 0x45d   : > { %v1278_v53 = vpop.eup %1277  ;;  %v1544_v18 = vadd.f32 1.0, %v1276_v13  ;;  %v754_v13 = vmul.f32 0.6, %v1534_v48 }
 0x45e   : > { %v799_v24 = vsel %vm798_vm6, %v1274_v1, %v795_v15  ;;  %v807_v25 = vmul.f32 %v1278_v53, %v774_v2  ;;  %vm812_vm8 = vweird.f32 %v1278_v53  ;;  %v848_v43 = vadd.f32 %v844_v31, %v752_v27 }
 0x45f   : > { %1279 = vrcp.f32 %v1544_v18  ;;  %v804_v29 = vsel %vm801_vm7, %v803_v20, %v799_v24  ;;  %vm813_vm10 = vmor %vm811_vm9, %vm812_vm8  ;;  %v832_v63 = vand.u32 2147483648, %v1544_v18  ;;  %v830_v0 = vand.u32 2147483647, %v1544_v18 }
 0x460   : > { %v837_v33 = vmul.f32 2.0, %v804_v29  ;;  %v858_v17 = vmul.f32 %v804_v29, %v1525_v38  ;;  %v808_v19 = vsub.f32 1.0, %v807_v25  ;;  %v853_v57 = vmul.f32 %v852_v23, %v848_v43 }
 0x461   : > { %vm826_vm13 = vweird.f32 %v1544_v18  ;;  %v833_v5 = vor.u32 1.1754944e-38, %v832_v63  ;;  %vm831_vm15 = vcmp.eq.f32.partialorder %v830_v0, 8.507059e+37  ;;  %v985_v31 = vstv %s1208_s30 }
 0x462   : > { %v1185_v12 = vadd.f32 -1.0, %v837_v33  ;;  %v874_v37 = vmul.f32 %v864_v30, %v858_v17  ;;  %v809_v40 = vmul.f32 %v1278_v53, %v808_v19 }
 0x464   : > { %v845_v21 = vmul.f32 %v1185_v12, %v757_v34  ;;  %v883_v44 = vmul.f32 %v1552_v32, %v874_v37  ;;  %v810_v46 = vadd.f32 %v1278_v53, %v809_v40 }
 0x465   : > { %v1280_v47 = vpop.eup %1279 }
 0x466   : > { %v849_v51 = vadd.f32 %v845_v21, %v753_v39  ;;  %v890_v52 = vpack.c.bf16 %v883_v44, %v882_v42  ;;  %v814_v54 = vsel %vm813_vm10, %v1278_v53, %v810_v46  ;;  %v822_v55 = vmul.f32 %v1280_v47, %v1544_v18 }
 0x467   : > { %v819_v38 = vsel %vm816_vm11, %v818_v50, %v814_v54  ;;  %vm827_vm12 = vweird.f32 %v1280_v47  ;;  %v755_v53 = vmul.f32 0.6, %v1537_v59 }
 0x468   : > { %895 = vrot.lane.b32.xlu2 %v890_v52, %s1289_s10  ;;  %v838_v56 = vmul.f32 2.0, %v819_v38  ;;  %v854_v58 = vmul.f32 %v852_v23, %v849_v51  ;;  %v823_v60 = vsub.f32 1.0, %v822_v55  ;;  %v859_v2 = vmul.f32 %v819_v38, %v1534_v48  ;;  %vm828_vm14 = vmor %vm826_vm13, %vm827_vm12 }
 0x469   : > { %v892_v52 = vperm.slane %v1393_v14, 6 }
 0x46a   : > { %v940_v49 = vpack.c.bf16 %v854_v58, %v853_v57  ;;  %v824_v41 = vmul.f32 %v1280_v47, %v823_v60  ;;  %v1186_v1 = vadd.f32 -1.0, %v838_v56  ;;  %v875_v10 = vmul.f32 %v866_v4, %v859_v2 }
 0x46c   : > { %1206 = vmatmul.msk.bf16.vlgmr.msrb.gmra.mxu1 %vm726_vm0, %v940_v49  ;;  %v825_v61 = vadd.f32 %v1280_v47, %v824_v41  ;;  %v846_v3 = vmul.f32 %v1186_v1, %v758_v6  ;;  %v884_v18 = vmul.f32 %v1552_v32, %v875_v10 }
 0x46e   : > { %v829_v62 = vsel %vm828_vm14, %v1280_v47, %v825_v61  ;;  %v850_v24 = vadd.f32 %v846_v3, %v754_v13 }
 0x46f   : > { %v834_v45 = vsel %vm831_vm15, %v833_v5, %v829_v62 }
 0x470   : > { %v839_v8 = vmul.f32 2.0, %v834_v45  ;;  %v860_v9 = vmul.f32 %v834_v45, %v1537_v59  ;;  %v855_v48 = vmul.f32 %v852_v23, %v850_v24  ;;  %v979_v59 = vlaneseq }
 0x472   : > { %v1187_v15 = vadd.f32 -1.0, %v839_v8  ;;  %v876_v16 = vmul.f32 %v868_v7, %v860_v9  ;;  %v980_v30 = vshrl.u32 %v979_v59, 7 }
 0x474   : > { %v847_v20 = vmul.f32 %v1187_v15, %v759_v11  ;;  %v885_v22 = vmul.f32 %v1552_v32, %v876_v16  ;;  %v986_v32 = vadd.s32 %v985_v31, %v980_v30  ;;  %v981_v33 = vadd.s32 8, %v980_v30 }
 0x475   : > { %v982_v12 = vadd.s32 16, %v980_v30 }
 0x476   : > { %v891_v25 = vpack.c.bf16 %v885_v22, %v884_v18  ;;  %v851_v26 = vadd.f32 %v847_v20, %v755_v53  ;;  %vm990_vm1 = vcmp.lt.s32.totalorder %v986_v32, 32  ;;  %v987_v36 = vadd.s32 %v985_v31, %v981_v33 }
 0x477   : > { %v988_v42 = vadd.s32 %v985_v31, %v982_v12 }
 0x478   : > { %897 = vrot.lane.b32.xlu1 %v891_v25, %s1289_s10  ;;  %v856_v27 = vmul.f32 %v852_v23, %v851_v26  ;;  %vm991_vm3 = vcmp.lt.s32.totalorder %v987_v36, 32  ;;  %v983_v23 = vadd.s32 24, %v980_v30 }
 0x479   : > { %vm992_vm4 = vcmp.lt.s32.totalorder %v988_v42, 32 }
 0x47a   : > { %v941_v28 = vpack.c.bf16 %v856_v27, %v855_v48  ;;  %v989_v46 = vadd.s32 %v985_v31, %v983_v23 }
 0x47c   : > { %1207 = vmatmul.msk.bf16.gmra.mxu1 %vm726_vm0, %v941_v28 }
 0x4c2   : > { %v896_v29 = vpop.permute.xlu2 %895 }
 0x4c3   : > { %1196 = vmatmul.msk.bf16.vlgmr.msra.gmra.mxu3 %vm726_vm0, %v896_v29 }
 0x4e9   : > { %v969_v17 = vpop.f32.mrf.mxu1 }
 0x4ea   : > { %v1002_v19 = vsel %vm990_vm1, %v969_v17, -1e+30  ;;  %v898_v34 = vpop.permute.xlu1 %897 }
 0x4eb   : > { %v1006_v35 = vpack.c.bf16 %v1002_v19, %v1002_v19  ;;  %1197 = vmatmul.msk.bf16.gmra.mxu3 %vm726_vm0, %v898_v34  ;;  %vm993_vm0 = vcmp.lt.s32.totalorder %v989_v46, 32 }
 0x4ed   : > { %1011 = vst.msk [vmem:[%s315_s12] sm:$0xf] %vm1010_vm2, %v1006_v35 }
 0x4f1   : > { %v971_v37 = vpop.f32.mrf.mxu1 }
 0x4f2   : > { %v1003_v40 = vsel %vm991_vm3, %v971_v37, -1e+30 }
 0x4f3   : > { %v1007_v39 = vpack.c.bf16 %v1003_v40, %v1003_v40 }
 0x4f5   : > { %1012 = vst.msk [vmem:[%s315_s12 + $0x4] sm:$0xf] %vm1010_vm2, %v1007_v39 }
 0x4f9   : > { %v974_v43 = vpop.f32.mrf.mxu1 }
 0x4fa   : > { %v1004_v21 = vsel %vm992_vm4, %v974_v43, -1e+30 }
 0x4fb   : > { %v1008_v44 = vpack.c.bf16 %v1004_v21, %v1004_v21 }
 0x4fd   : > { %1013 = vst.msk [vmem:[%s315_s12 + $0x8] sm:$0xf] %vm1010_vm2, %v1008_v44 }
 0x501   : > { %v976_v47 = vpop.f32.mrf.mxu1 }
 0x502   : > { %v1005_v50 = vsel %vm993_vm0, %v976_v47, -1e+30 }
 0x503   : > { %v1009_v51 = vpack.c.bf16 %v1005_v50, %v1005_v50 }
 0x505   : > { %1014 = vst.msk [vmem:[%s315_s12 + $0xc] sm:$0xf] %vm1010_vm2, %v1009_v51 }
 0x546   : > { %v926_v54 = vpop.f32.mrf.mxu3 }
 0x547   : > { %v927_v55 = vadd.f32 %v926_v54, %v892_v52 }
 0x549   : > { %v1015_v38 = vsel %vm990_vm1, %v927_v55, 0.0 }
 0x54a   : > { %v1019_v56 = vpack.c.bf16 %v1015_v38, %v1015_v38 }
 0x54c   : > { %1023 = vst.msk [vmem:[%s321_s15] sm:$0xf] %vm1010_vm2, %v1019_v56 }
 0x54e   : > { %v928_v57 = vpop.f32.mrf.mxu3 }
 0x54f   : > { %v929_v58 = vadd.f32 %v928_v57, %v892_v52 }
 0x551   : > { %v1016_v60 = vsel %vm991_vm3, %v929_v58, 0.0 }
 0x552   : > { %v1020_v63 = vpack.c.bf16 %v1016_v60, %v1016_v60 }
 0x554   : > { %1024 = vst.msk [vmem:[%s321_s15 + $0x4] sm:$0xf] %vm1010_vm2, %v1020_v63 }
 0x56e   : > { %v931_v14 = vpop.f32.mrf.mxu3 }
 0x56f   : > { %v932_v49 = vadd.f32 %v931_v14, %v892_v52 }
 0x571   : > { %v1017_v41 = vsel %vm992_vm4, %v932_v49, 0.0 }
 0x572   : > { %v1021_v0 = vpack.c.bf16 %v1017_v41, %v1017_v41 }
 0x574   : > { %1025 = vst.msk [vmem:[%s321_s15 + $0x8] sm:$0xf] %vm1010_vm2, %v1021_v0 }
 0x576   : > { %v933_v1 = vpop.f32.mrf.mxu3 }
 0x577   : > { %v934_v2 = vadd.f32 %v933_v1, %v892_v52 }
 0x579   : > { %v1018_v61 = vsel %vm993_vm0, %v934_v2, 0.0 }
 0x57a   : > { %v1022_v4 = vpack.c.bf16 %v1018_v61, %v1018_v61 }
 0x57c   : > { %1026 = vst.msk [vmem:[%s321_s15 + $0xc] sm:$0xf] %vm1010_vm2, %v1022_v4 }
 0x57d PF: > { %s19_s27 = sadd.s32 1, %s1287_s27  }
 0x57e   : > { %p16_p4 = scmp.ge.s32.totalorder %s19_s27, 4  }
 0x580   :  { %18 = sbr.rel (!%p16_p4) target bundleno = 1 (0x1), region = 90 }

// kernel: tile.28
= control target key start
LH: loop header
LB: loop body
LE: loop exit
PB: predicated region body
PF: predicated region fallthrough
CT: control target
= control target key end

     0   :  { %s22_s0 = inlined_call_operand.vmem [shape: f32[32], index: 0, kind: input, shape index: {}]   ;;  %s23_s1 = inlined_call_operand.vmem [shape: f32[4,32], index: 1, kind: output, shape index: {}]  }
   0x1   :  { %v4_v0 = vld [vmem:[%s22_s0] ss:$0 sm:$0xff] }
   0x2   :  { %5 = vst [vmem:[%s23_s1] sm:$0xf] %v4_v0 }

// kernel: tile.43
= control target key start
LH: loop header
LB: loop body
LE: loop exit
PB: predicated region body
PF: predicated region fallthrough
CT: control target
= control target key end

     0   :  { %s22_s0 = inlined_call_operand.vmem [shape: f32[96], index: 0, kind: input, shape index: {}]   ;;  %s23_s1 = inlined_call_operand.vmem [shape: f32[4,96], index: 1, kind: output, shape index: {}]  }
   0x1   :  { %v4_v0 = vld [vmem:[%s22_s0] ss:$0 sm:$0xff] }
   0x2   :  { %5 = vst [vmem:[%s23_s1] sm:$0xf] %v4_v0 }

// kernel: equiformer_block_forward.3
= control target key start
LH: loop header
LB: loop body
LE: loop exit
PB: predicated region body
PF: predicated region fallthrough
CT: control target
= control target key end

     0   :  { %s2107_s3 = inlined_call_operand.vmem [shape: bf16[128,128], index: 3, kind: input, shape index: {}]   ;;  %s2108_s0 = inlined_call_operand.vmem [shape: bf16[8,8,128], index: 0, kind: input, shape index: {}]   ;;  %s2109_s1 = inlined_call_operand.vmem [shape: bf16[8,8,128], index: 1, kind: input, shape index: {}]   ;;  %s2110_s4 = inlined_call_operand.vmem [shape: f32[128,128], index: 4, kind: input, shape index: {}]   ;;  %s2111_s7 = inlined_call_operand.vmem [shape: f32[8,384], index: 7, kind: input, shape index: {}]   ;;  %s2112_s2 = inlined_call_operand.vmem [shape: f32[8,128], index: 2, kind: input, shape index: {}]   ;;  %s2113_s5 = inlined_call_operand.vmem [shape: bf16[128,384], index: 5, kind: input, shape index: {}]   ;;  %s2114_s6 = inlined_call_operand.vmem [shape: bf16[384,128], index: 6, kind: input, shape index: {}]   ;;  %s2115_s8 = inlined_call_operand.vmem [shape: f32[8,128], index: 8, kind: output, shape index: {}]  }
   0x1   :  { %v1301_v0 = vld [vmem:[%s2107_s3 + $0x38] sm:$0xff]  ;;  %v1300_v1 = vld [vmem:[%s2107_s3 + $0x30] sm:$0xff]  ;;  %v1351_v2 = vld [vmem:[%s2108_s0] sm:$0xff]  }
   0x2   :  { %473 = vmatpush.bf16.msra.mxu0 %v1301_v0  ;;  %v1488_v3 = vunpack.c.l.bf16 %v1351_v2  ;;  %v1490_v4 = vunpack.c.h.bf16 %v1351_v2  ;;  %v1382_v5 = vld [vmem:[%s2108_s0 + $0x8] sm:$0xff]   ;;  %v1383_v6 = vld [vmem:[%s2108_s0 + $0x10] sm:$0xff]   ;;  %v1384_v7 = vld [vmem:[%s2108_s0 + $0x18] sm:$0xff]  }
   0x3   :  { %v1501_v8 = vunpack.c.l.bf16 %v1382_v5  ;;  %v1503_v9 = vunpack.c.h.bf16 %v1382_v5  ;;  %v1505_v10 = vunpack.c.l.bf16 %v1383_v6  ;;  %v1507_v11 = vunpack.c.h.bf16 %v1383_v6  ;;  %v1299_v14 = vld [vmem:[%s2107_s3 + $0x28] sm:$0xff]  ;;  %v1298_v25 = vld [vmem:[%s2107_s3 + $0x20] sm:$0xff]  ;;  %v1297_v42 = vld [vmem:[%s2107_s3 + $0x18] sm:$0xff] }
   0x4   :  { %v1509_v12 = vunpack.c.l.bf16 %v1384_v7  ;;  %v1511_v13 = vunpack.c.h.bf16 %v1384_v7  ;;  %v64_v15 = vrot.slane %v1488_v3, 4  ;;  %v70_v16 = vrot.slane %v1490_v4, 4  ;;  %v1296_v59 = vld [vmem:[%s2107_s3 + $0x10] sm:$0xff] }
   0x5   :  { %v76_v17 = vrot.slane %v1501_v8, 4  ;;  %v82_v18 = vrot.slane %v1503_v9, 4  ;;  %v88_v19 = vrot.slane %v1505_v10, 4  ;;  %v94_v20 = vrot.slane %v1507_v11, 4 }
   0x6   :  { %474 = vmatpush.bf16.msra.mxu0 %v1300_v1  ;;  %v65_v21 = vmax.f32 %v1488_v3, %v64_v15  ;;  %v71_v22 = vmax.f32 %v1490_v4, %v70_v16  ;;  %v100_v23 = vrot.slane %v1509_v12, 4  ;;  %v106_v24 = vrot.slane %v1511_v13, 4 }
   0x7   :  { %v77_v26 = vmax.f32 %v1501_v8, %v76_v17  ;;  %v83_v27 = vmax.f32 %v1503_v9, %v82_v18  ;;  %v89_v28 = vmax.f32 %v1505_v10, %v88_v19  ;;  %v95_v29 = vmax.f32 %v1507_v11, %v94_v20  ;;  %v1295_v19 = vld [vmem:[%s2107_s3 + $0x8] sm:$0xff] }
   0x8   :  { %v66_v30 = vrot.slane %v65_v21, 2  ;;  %v72_v31 = vrot.slane %v71_v22, 2  ;;  %v101_v32 = vmax.f32 %v1509_v12, %v100_v23  ;;  %v107_v33 = vmax.f32 %v1511_v13, %v106_v24 }
   0x9   :  { %v78_v34 = vrot.slane %v77_v26, 2  ;;  %v84_v35 = vrot.slane %v83_v27, 2  ;;  %v90_v36 = vrot.slane %v89_v28, 2  ;;  %v96_v37 = vrot.slane %v95_v29, 2 }
   0xa   :  { %475 = vmatpush.bf16.msra.mxu0 %v1299_v14  ;;  %v67_v38 = vmax.f32 %v65_v21, %v66_v30  ;;  %v73_v39 = vmax.f32 %v71_v22, %v72_v31  ;;  %v102_v40 = vrot.slane %v101_v32, 2  ;;  %v108_v41 = vrot.slane %v107_v33, 2  ;;  %v1562_v22 = vld [vmem:[%s2109_s1] sm:$0xff]  }
   0xb   :  { %v79_v43 = vmax.f32 %v77_v26, %v78_v34  ;;  %v85_v44 = vmax.f32 %v83_v27, %v84_v35  ;;  %v91_v45 = vmax.f32 %v89_v28, %v90_v36  ;;  %v97_v46 = vmax.f32 %v95_v29, %v96_v37 }
   0xc   :  { %v68_v47 = vrot.slane %v67_v38, 1  ;;  %v74_v48 = vrot.slane %v73_v39, 1  ;;  %v103_v49 = vmax.f32 %v101_v32, %v102_v40  ;;  %v109_v50 = vmax.f32 %v107_v33, %v108_v41 }
   0xd   :  { %v80_v51 = vrot.slane %v79_v43, 1  ;;  %v86_v52 = vrot.slane %v85_v44, 1  ;;  %v92_v53 = vrot.slane %v91_v45, 1  ;;  %v98_v54 = vrot.slane %v97_v46, 1 }
   0xe   :  { %476 = vmatpush.bf16.msra.mxu0 %v1298_v25  ;;  %v69_v55 = vmax.f32 %v67_v38, %v68_v47  ;;  %v75_v56 = vmax.f32 %v73_v39, %v74_v48  ;;  %v104_v57 = vrot.slane %v103_v49, 1  ;;  %v110_v58 = vrot.slane %v109_v50, 1  ;;  %v1570_v25 = vld [vmem:[%s2109_s1 + $0x8] sm:$0xff]  }
   0xf   :  { %v81_v60 = vmax.f32 %v79_v43, %v80_v51  ;;  %v87_v61 = vmax.f32 %v85_v44, %v86_v52  ;;  %v93_v62 = vmax.f32 %v91_v45, %v92_v53  ;;  %v99_v63 = vmax.f32 %v97_v46, %v98_v54 }
  0x10   :  { %v105_v0 = vmax.f32 %v103_v49, %v104_v57  ;;  %v111_v1 = vmax.f32 %v109_v50, %v110_v58  ;;  %v112_v2 = vsub.f32 %v1488_v3, %v69_v55  ;;  %v113_v5 = vsub.f32 %v1490_v4, %v75_v56 }
  0x11   :  { %v114_v6 = vsub.f32 %v1501_v8, %v81_v60  ;;  %v115_v7 = vsub.f32 %v1503_v9, %v87_v61  ;;  %v116_v14 = vsub.f32 %v1505_v10, %v93_v62  ;;  %v117_v15 = vsub.f32 %v1507_v11, %v99_v63  ;;  %v1294_v11 = vld [vmem:[%s2107_s3] sm:$0xff] }
  0x12   :  { %477 = vmatpush.bf16.msra.mxu0 %v1297_v42  ;;  %v118_v16 = vsub.f32 %v1509_v12, %v105_v0  ;;  %v120_v17 = vmul.f32 1.442695, %v112_v2  ;;  %v122_v18 = vmul.f32 1.442695, %v113_v5  ;;  %v119_v3 = vsub.f32 %v1511_v13, %v111_v1  ;;  %v1604_v2 = vld [vmem:[%s2109_s1 + $0x10] sm:$0xff]  }
  0x13   :  { %v124_v4 = vmul.f32 1.442695, %v114_v6  ;;  %v126_v20 = vmul.f32 1.442695, %v115_v7  ;;  %v128_v8 = vmul.f32 1.442695, %v116_v14  ;;  %v1368_v31 = vunpack.c.l.bf16 %v1562_v22 }
  0x14   :  { %1388 = vpow2.f32 %v120_v17  ;;  %v130_v9 = vmul.f32 1.442695, %v117_v15  ;;  %v132_v10 = vmul.f32 1.442695, %v118_v16  ;;  %v134_v12 = vmul.f32 1.442695, %v119_v3 }
  0x15   :  { %1390 = vpow2.f32 %v122_v18  ;;  %v1369_v32 = vunpack.c.h.bf16 %v1562_v22  ;;  %v1372_v36 = vunpack.c.l.bf16 %v1570_v25  ;;  %v1373_v41 = vunpack.c.h.bf16 %v1570_v25  ;;  %v498_v22 = vld [vmem:[%s2110_s4 + $0x48] sm:$0xff] }
  0x16   :  { %478 = vmatpush.bf16.msra.mxu0 %v1296_v59  ;;  %1392 = vpow2.f32 %v124_v4 }
  0x17   :  { %1394 = vpow2.f32 %v126_v20 }
  0x18   :  { %1396 = vpow2.f32 %v128_v8 }
  0x19   :  { %1398 = vpow2.f32 %v130_v9  ;;  %v1376_v9 = vunpack.c.l.bf16 %v1604_v2 }
  0x1a   :  { %479 = vmatpush.bf16.msra.mxu0 %v1295_v19  ;;  %v1555_v21 = vpop.eup %1388  ;;  %1400 = vpow2.f32 %v132_v10  ;;  %v1609_v19 = vld [vmem:[%s2109_s1 + $0x18] sm:$0xff]  }
  0x1b   :  { %v1557_v13 = vpop.eup %1390  ;;  %1402 = vpow2.f32 %v134_v12  ;;  %v136_v23 = vrot.slane %v1555_v21, 4  ;;  %v1377_v12 = vunpack.c.h.bf16 %v1604_v2  ;;  %v504_v2 = vld [vmem:[%s2110_s4 + $0x78] sm:$0xff] }
  0x1c   :  { %v1565_v24 = vpop.eup %1392  ;;  %v142_v26 = vrot.slane %v1557_v13, 4  ;;  %505 = vmatpush.msra.mxu1 %v504_v2  ;;  %527 = vmatpush.msra.mxu2 %v504_v2 }
  0x1d   :  { %v1573_v27 = vpop.eup %1394  ;;  %v137_v28 = vadd.f32 %v1555_v21, %v136_v23  ;;  %v148_v29 = vrot.slane %v1565_v24, 4 }
  0x1e   :  { %480 = vmatpush.bf16.msra.mxu0 %v1294_v11  ;;  %v1577_v30 = vpop.eup %1396  ;;  %v143_v33 = vadd.f32 %v1557_v13, %v142_v26  ;;  %v154_v34 = vrot.slane %v1573_v27, 4 }
  0x1f   :  { %v1583_v35 = vpop.eup %1398  ;;  %v138_v37 = vrot.slane %v137_v28, 2  ;;  %v149_v38 = vadd.f32 %v1565_v24, %v148_v29  ;;  %v160_v39 = vrot.slane %v1577_v30, 4  ;;  %v1380_v29 = vunpack.c.l.bf16 %v1609_v19 }
  0x20   :  { %v1588_v40 = vpop.eup %1400  ;;  %v144_v42 = vrot.slane %v143_v33, 2  ;;  %v155_v43 = vadd.f32 %v1573_v27, %v154_v34  ;;  %v166_v44 = vrot.slane %v1583_v35, 4 }
  0x21   :  { %v1593_v45 = vpop.eup %1402  ;;  %v139_v46 = vadd.f32 %v138_v37, %v137_v28  ;;  %v150_v47 = vrot.slane %v149_v38, 2  ;;  %v161_v48 = vadd.f32 %v1577_v30, %v160_v39  ;;  %v172_v49 = vrot.slane %v1588_v40, 4 }
  0x22   :  { %v145_v50 = vadd.f32 %v144_v42, %v143_v33  ;;  %v156_v51 = vrot.slane %v155_v43, 2  ;;  %v167_v52 = vadd.f32 %v1583_v35, %v166_v44  ;;  %v178_v53 = vrot.slane %v1593_v45, 4 }
  0x23   :  { %v140_v54 = vrot.slane %v139_v46, 1  ;;  %v151_v55 = vadd.f32 %v150_v47, %v149_v38  ;;  %v162_v56 = vrot.slane %v161_v48, 2  ;;  %v173_v57 = vadd.f32 %v1588_v40, %v172_v49 }
  0x24   :  { %v146_v58 = vrot.slane %v145_v50, 1  ;;  %v157_v59 = vadd.f32 %v156_v51, %v155_v43  ;;  %v168_v60 = vrot.slane %v167_v52, 2  ;;  %v179_v61 = vadd.f32 %v1593_v45, %v178_v53 }
  0x25   :  { %v141_v62 = vadd.f32 %v140_v54, %v139_v46  ;;  %v152_v63 = vrot.slane %v151_v55, 1  ;;  %v163_v0 = vadd.f32 %v162_v56, %v161_v48  ;;  %v174_v1 = vrot.slane %v173_v57, 2 }
  0x26   :  { %v147_v5 = vadd.f32 %v146_v58, %v145_v50  ;;  %v158_v6 = vrot.slane %v157_v59, 1  ;;  %v169_v7 = vadd.f32 %v168_v60, %v167_v52  ;;  %v180_v14 = vrot.slane %v179_v61, 2 }
  0x27   :  { %v153_v15 = vadd.f32 %v152_v63, %v151_v55  ;;  %v164_v16 = vrot.slane %v163_v0, 1  ;;  %v175_v17 = vadd.f32 %v174_v1, %v173_v57  ;;  %v184_v18 = vadd.f32 1e-16, %v141_v62 }
  0x28   :  { %v159_v3 = vadd.f32 %v158_v6, %v157_v59  ;;  %v170_v4 = vrot.slane %v169_v7, 1  ;;  %v181_v20 = vadd.f32 %v180_v14, %v179_v61  ;;  %v1611_v8 = vadd.f32 1e-16, %v147_v5 }
  0x29   :  { %v165_v10 = vadd.f32 %v164_v16, %v163_v0  ;;  %v176_v11 = vrot.slane %v175_v17, 1  ;;  %1404 = vrcp.f32 %v184_v18  ;;  %v1615_v28 = vadd.f32 1e-16, %v153_v15 }
  0x2a   :  { %v171_v23 = vadd.f32 %v170_v4, %v169_v7  ;;  %v182_v26 = vrot.slane %v181_v20, 1  ;;  %v1618_v34 = vadd.f32 1e-16, %v159_v3  ;;  %v201_v37 = vand.u32 2147483647, %v184_v18 }
  0x2b   :  { %v177_v33 = vadd.f32 %v176_v11, %v175_v17  ;;  %v1381_v38 = vunpack.c.h.bf16 %v1609_v19  ;;  %v203_v42 = vand.u32 2147483648, %v184_v18  ;;  %1406 = vrcp.f32 %v1611_v8 }
  0x2c   :  { %v183_v39 = vadd.f32 %v182_v26, %v181_v20  ;;  %v1622_v43 = vadd.f32 1e-16, %v165_v10  ;;  %v1624_v44 = vadd.f32 1e-16, %v171_v23  ;;  %vm197_vm0 = vweird.f32 %v184_v18 }
  0x2d   :  { %v216_v46 = vand.u32 2147483647, %v1611_v8  ;;  %v1627_v47 = vadd.f32 1e-16, %v177_v33  ;;  %vm212_vm1 = vweird.f32 %v1611_v8  ;;  %v218_v48 = vand.u32 2147483648, %v1611_v8 }
  0x2e   :  { %1408 = vrcp.f32 %v1615_v28  ;;  %vm1632_vm2 = vcmp.eq.f32.partialorder %v201_v37, 8.507059e+37  ;;  %v231_v51 = vand.u32 2147483647, %v1615_v28  ;;  %v233_v52 = vand.u32 2147483648, %v1615_v28 }
  0x2f   :  { %v1405_v49 = vpop.eup %1404  ;;  %1410 = vrcp.f32 %v1618_v34  ;;  %v1639_v53 = vadd.f32 1e-16, %v183_v39  ;;  %v204_v55 = vor.u32 1.1754944e-38, %v203_v42  ;;  %vm227_vm3 = vweird.f32 %v1615_v28 }
  0x30   :  { %v193_v54 = vmul.f32 %v1405_v49, %v184_v18  ;;  %vm198_vm4 = vweird.f32 %v1405_v49  ;;  %vm1642_vm5 = vcmp.eq.f32.partialorder %v216_v46, 8.507059e+37  ;;  %v246_v57 = vand.u32 2147483647, %v1618_v34 }
  0x31   :  { %v248_v58 = vand.u32 2147483648, %v1618_v34  ;;  %v1407_v59 = vpop.eup %1406  ;;  %v219_v61 = vor.u32 1.1754944e-38, %v218_v48  ;;  %vm242_vm6 = vweird.f32 %v1618_v34  ;;  %1412 = vrcp.f32 %v1622_v43  ;;  %vm1661_vm10 = vmor %vm197_vm0, %vm198_vm4 }
  0x32   :  { %v194_v60 = vsub.f32 1.0, %v193_v54  ;;  %v208_v62 = vmul.f32 %v1407_v59, %v1611_v8  ;;  %vm1651_vm7 = vcmp.eq.f32.partialorder %v231_v51, 8.507059e+37  ;;  %v234_v0 = vor.u32 1.1754944e-38, %v233_v52 }
  0x33   :  { %vm257_vm8 = vweird.f32 %v1622_v43  ;;  %v261_v1 = vand.u32 2147483647, %v1622_v43  ;;  %vm213_vm9 = vweird.f32 %v1407_v59  ;;  %v263_v7 = vand.u32 2147483648, %v1622_v43 }
  0x34   :  { %v1409_v5 = vpop.eup %1408  ;;  %v195_v6 = vmul.f32 %v1405_v49, %v194_v60  ;;  %1414 = vrcp.f32 %v1624_v44  ;;  %v209_v16 = vsub.f32 1.0, %v208_v62  ;;  %vm1666_vm11 = vcmp.eq.f32.partialorder %v246_v57, 8.507059e+37  ;;  %vm1681_vm0 = vmor %vm212_vm1, %vm213_vm9 }
  0x35   :  { %v1411_v14 = vpop.eup %1410  ;;  %v223_v17 = vmul.f32 %v1409_v5, %v1615_v28  ;;  %v249_v4 = vor.u32 1.1754944e-38, %v248_v58  ;;  %vm228_vm12 = vweird.f32 %v1409_v5  ;;  %vm272_vm13 = vweird.f32 %v1624_v44 }
  0x36   :  { %v196_v20 = vadd.f32 %v1405_v49, %v195_v6  ;;  %v238_v10 = vmul.f32 %v1411_v14, %v1618_v34  ;;  %v210_v11 = vmul.f32 %v1407_v59, %v209_v16  ;;  %vm243_vm14 = vweird.f32 %v1411_v14  ;;  %vm1693_vm1 = vmor %vm227_vm3, %vm228_vm12 }
  0x37   :  { %v224_v18 = vsub.f32 1.0, %v223_v17  ;;  %vm1672_vm15 = vcmp.eq.f32.partialorder %v261_v1, 8.507059e+37  ;;  %v264_v26 = vor.u32 1.1754944e-38, %v263_v7  ;;  %v1413_v33 = vpop.eup %1412  ;;  %v276_v46 = vand.u32 2147483647, %v1624_v44 }
  0x38   :  { %v200_v37 = vsel %vm1661_vm10, %v1405_v49, %v196_v20  ;;  %v239_v42 = vsub.f32 1.0, %v238_v10  ;;  %1416 = vrcp.f32 %v1627_v47  ;;  %v211_v51 = vadd.f32 %v1407_v59, %v210_v11 }
  0x39   :  { %v205_v48 = vsel %vm1632_vm2, %v204_v55, %v200_v37  ;;  %v225_v52 = vmul.f32 %v1409_v5, %v224_v18  ;;  %v253_v54 = vmul.f32 %v1413_v33, %v1622_v43  ;;  %vm258_vm4 = vweird.f32 %v1413_v33  ;;  %vm1704_vm2 = vmor %vm242_vm6, %vm243_vm14 }
  0x3a   :  { %v1415_v49 = vpop.eup %1414  ;;  %v240_v57 = vmul.f32 %v1411_v14, %v239_v42  ;;  %v278_v58 = vand.u32 2147483648, %v1624_v44  ;;  %vm287_vm9 = vweird.f32 %v1627_v47  ;;  %v215_v50 = vsel %vm1681_vm0, %v1407_v59, %v211_v51 }
  0x3b   :  { %v226_v55 = vadd.f32 %v1409_v5, %v225_v52  ;;  %v254_v28 = vsub.f32 1.0, %v253_v54  ;;  %v268_v62 = vmul.f32 %v1415_v49, %v1624_v44  ;;  %v206_v1 = vmul.f32 %v1555_v21, %v205_v48 }
  0x3c   :  { %v220_v6 = vsel %vm1642_vm5, %v219_v61, %v215_v50  ;;  %v241_v7 = vadd.f32 %v1411_v14, %v240_v57  ;;  %vm1712_vm3 = vcmp.eq.f32.partialorder %v276_v46, 8.507059e+37  ;;  %vm273_vm6 = vweird.f32 %v1415_v49  ;;  %vm1725_vm5 = vmor %vm257_vm8, %vm258_vm4 }
  0x3d   :  { %v230_v34 = vsel %vm1693_vm1, %v1409_v5, %v226_v55  ;;  %v255_v59 = vmul.f32 %v1413_v33, %v254_v28  ;;  %v269_v16 = vsub.f32 1.0, %v268_v62  ;;  %v279_v61 = vor.u32 1.1754944e-38, %v278_v58 }
  0x3e   :  { %v1417_v17 = vpop.eup %1416  ;;  %v235_v20 = vsel %vm1651_vm7, %v234_v0, %v230_v34  ;;  %v245_v21 = vsel %vm1704_vm2, %v1411_v14, %v241_v7  ;;  %v291_v5 = vand.u32 2147483647, %v1627_v47  ;;  %v221_v10 = vmul.f32 %v1557_v13, %v220_v6  ;;  %vm1737_vm7 = vmor %vm272_vm13, %vm273_vm6 }
  0x3f   :  { %v250_v11 = vsel %vm1666_vm11, %v249_v4, %v245_v21  ;;  %v256_v63 = vadd.f32 %v1413_v33, %v255_v59  ;;  %v270_v0 = vmul.f32 %v1415_v49, %v269_v16  ;;  %v236_v18 = vmul.f32 %v1565_v24, %v235_v20  ;;  %v502_v21 = vld [vmem:[%s2110_s4 + $0x68] sm:$0xff] }
  0x40   :  { %v251_v14 = vmul.f32 %v1573_v27, %v250_v11  ;;  %v283_v37 = vmul.f32 %v1417_v17, %v1627_v47  ;;  %v293_v39 = vand.u32 2147483648, %v1627_v47  ;;  %vm288_vm8 = vweird.f32 %v1417_v17 }
  0x41   :  { %v260_v13 = vsel %vm1725_vm5, %v1413_v33, %v256_v63  ;;  %v271_v3 = vadd.f32 %v1415_v49, %v270_v0  ;;  %1418 = vrcp.f32 %v1639_v53  ;;  %vm1748_vm10 = vcmp.eq.f32.partialorder %v291_v5, 8.507059e+37  ;;  %vm1767_vm11 = vmor %vm287_vm9, %vm288_vm8 }
  0x42   :  { %v265_v24 = vsel %vm1672_vm15, %v264_v26, %v260_v13  ;;  %v284_v27 = vsub.f32 1.0, %v283_v37  ;;  %v306_v4 = vand.u32 2147483647, %v1639_v53  ;;  %v308_v33 = vand.u32 2147483648, %v1639_v53 }
  0x43   :  { %v266_v42 = vmul.f32 %v1577_v30, %v265_v24  ;;  %v275_v46 = vsel %vm1737_vm7, %v1415_v49, %v271_v3  ;;  %v312_v48 = vmul.f32 %v1368_v31, %v206_v1  ;;  %v294_v51 = vor.u32 1.1754944e-38, %v293_v39 }
  0x44   :  { %v280_v23 = vsel %vm1712_vm3, %v279_v61, %v275_v46  ;;  %v285_v26 = vmul.f32 %v1417_v17, %v284_v27  ;;  %v313_v52 = vmul.f32 %v1369_v32, %v221_v10  ;;  %vm302_vm12 = vweird.f32 %v1639_v53  ;;  %v500_v27 = vld [vmem:[%s2110_s4 + $0x58] sm:$0xff] }
  0x45   :  { %v281_v54 = vmul.f32 %v1583_v35, %v280_v23  ;;  %v314_v31 = vmul.f32 %v1372_v36, %v236_v18  ;;  %v315_v49 = vmul.f32 %v1373_v41, %v251_v14  ;;  %vm1776_vm13 = vcmp.eq.f32.partialorder %v306_v4, 8.507059e+37  ;;  %v501_v14 = vld [vmem:[%s2110_s4 + $0x60] sm:$0xff] }
  0x46   :  { %v286_v8 = vadd.f32 %v1417_v17, %v285_v26  ;;  %v316_v32 = vmul.f32 %v1376_v9, %v266_v42  ;;  %v320_v35 = vrot.slane %v312_v48, 4  ;;  %v326_v47 = vrot.slane %v313_v52, 4 }
  0x47   :  { %v1419_v57 = vpop.eup %1418  ;;  %v309_v58 = vor.u32 1.1754944e-38, %v308_v33  ;;  %v317_v50 = vmul.f32 %v1377_v12, %v281_v54  ;;  %v332_v55 = vrot.slane %v314_v31, 4  ;;  %v338_v36 = vrot.slane %v315_v49, 4  ;;  %v503_v12 = vld [vmem:[%s2110_s4 + $0x70] sm:$0xff] }
  0x48   :  { %v290_v25 = vsel %vm1767_vm11, %v1417_v17, %v286_v8  ;;  %v298_v41 = vmul.f32 %v1419_v57, %v1639_v53  ;;  %vm303_vm14 = vweird.f32 %v1419_v57  ;;  %v321_v60 = vadd.f32 %v320_v35, %v312_v48  ;;  %506 = vmatpush.msra.mxu1 %v503_v12  ;;  %528 = vmatpush.msra.mxu2 %v503_v12 }
  0x49   :  { %v295_v28 = vsel %vm1748_vm10, %v294_v51, %v290_v25  ;;  %v327_v9 = vadd.f32 %v326_v47, %v313_v52  ;;  %v333_v62 = vadd.f32 %v332_v55, %v314_v31  ;;  %v339_v1 = vadd.f32 %v338_v36, %v315_v49  ;;  %vm1804_vm0 = vmor %vm302_vm12, %vm303_vm14  ;;  %v499_v51 = vld [vmem:[%s2110_s4 + $0x50] sm:$0xff] }
  0x4a   :  { %v296_v6 = vmul.f32 %v1588_v40, %v295_v28  ;;  %v299_v7 = vsub.f32 1.0, %v298_v41  ;;  %v322_v15 = vrot.slane %v321_v60, 2  ;;  %v344_v34 = vrot.slane %v316_v32, 4  ;;  %507 = vmatpush.msra.mxu1 %v502_v21  ;;  %529 = vmatpush.msra.mxu2 %v502_v21  ;;  %v497_v41 = vld [vmem:[%s2110_s4 + $0x40] sm:$0xff]  ;;  %v492_v40 = vld [vmem:[%s2110_s4 + $0x18] sm:$0xff] }
  0x4b   :  { %v328_v59 = vrot.slane %v327_v9, 2  ;;  %v334_v16 = vrot.slane %v333_v62, 2  ;;  %v340_v17 = vrot.slane %v339_v1, 2  ;;  %v350_v20 = vrot.slane %v317_v50, 4 }
  0x4c   :  { %v300_v56 = vmul.f32 %v1419_v57, %v299_v7  ;;  %v318_v61 = vmul.f32 %v1380_v29, %v296_v6  ;;  %v323_v5 = vadd.f32 %v322_v15, %v321_v60  ;;  %v345_v10 = vadd.f32 %v344_v34, %v316_v32  ;;  %508 = vmatpush.msra.mxu1 %v501_v14  ;;  %v495_v15 = vld [vmem:[%s2110_s4 + $0x30] sm:$0xff] }
  0x4d   :  { %vm409_vm15 = vcmask 1041409   ;;  %v329_v11 = vadd.f32 %v328_v59, %v327_v9  ;;  %v335_v63 = vadd.f32 %v334_v16, %v333_v62  ;;  %v341_v0 = vadd.f32 %v340_v17, %v339_v1  ;;  %530 = vmatpush.msra.mxu2 %v501_v14  ;;  %v494_v17 = vld [vmem:[%s2110_s4 + $0x28] sm:$0xff] }
  0x4e   :  { %v351_v18 = vadd.f32 %v350_v20, %v317_v50  ;;  %v301_v29 = vadd.f32 %v1419_v57, %v300_v56  ;;  %v324_v43 = vrot.slane %v323_v5, 1  ;;  %v346_v37 = vrot.slane %v345_v10, 2  ;;  %509 = vmatpush.msra.mxu1 %v500_v27 }
  0x4f   :  { %v356_v39 = vrot.slane %v318_v61, 4  ;;  %v330_v13 = vrot.slane %v329_v11, 1  ;;  %v336_v53 = vrot.slane %v335_v63, 1  ;;  %v342_v3 = vrot.slane %v341_v0, 1  ;;  %531 = vmatpush.msra.mxu2 %v500_v27 }
  0x50   :  { %v352_v24 = vrot.slane %v351_v18, 2  ;;  %v305_v44 = vsel %vm1804_vm0, %v1419_v57, %v301_v29  ;;  %v325_v4 = vadd.f32 %v324_v43, %v323_v5  ;;  %v347_v42 = vadd.f32 %v346_v37, %v345_v10  ;;  %510 = vmatpush.msra.mxu1 %v499_v51  ;;  %v491_v37 = vld [vmem:[%s2110_s4 + $0x10] sm:$0xff] }
  0x51   :  { %v357_v46 = vadd.f32 %v356_v39, %v318_v61  ;;  %v310_v33 = vsel %vm1776_vm13, %v309_v58, %v305_v44  ;;  %v331_v48 = vadd.f32 %v330_v13, %v329_v11  ;;  %v337_v23 = vadd.f32 %v336_v53, %v335_v63  ;;  %532 = vmatpush.msra.mxu2 %v499_v51  ;;  %v493_v61 = vld [vmem:[%s2110_s4 + $0x20] sm:$0xff]  ;;  %v490_v39 = vld [vmem:[%s2110_s4 + $0x8] sm:$0xff]  ;;  %v1193_v51 = vld [vmem:[%s2113_s5 + $0xb0] sm:$0xf] }
  0x52   :  { %v343_v26 = vadd.f32 %v342_v3, %v341_v0  ;;  %v311_v52 = vmul.f32 %v1593_v45, %v310_v33  ;;  %v348_v54 = vrot.slane %v347_v42, 1  ;;  %v353_v30 = vadd.f32 %v352_v24, %v351_v18  ;;  %511 = vmatpush.msra.mxu1 %v498_v22  ;;  %v489_v13 = vld [vmem:[%s2110_s4] sm:$0xff]  ;;  %v1324_v33 = vld [vmem:[%s2113_s5 + $0xb0] sm:$0xf0] }
  0x53   :  { %v358_v31 = vrot.slane %v357_v46, 2  ;;  %v385_v49 = vpack.c.bf16 %v325_v4, %v325_v4  ;;  %v386_v8 = vpack.c.bf16 %v331_v48, %v331_v48  ;;  %v387_v32 = vpack.c.bf16 %v337_v23, %v337_v23  ;;  %533 = vmatpush.msra.mxu2 %v498_v22  ;;  %v1858_v53 = vld [vmem:[%s2111_s7] sm:$0xff]  ;;  %v1323_v48 = vld [vmem:[%s2113_s5 + $0xac] sm:$0xf]  ;;  %v1320_v22 = vld [vmem:[%s2113_s5 + $0x94] sm:$0xf] }
  0x54   :  { %v388_v35 = vpack.c.bf16 %v343_v26, %v343_v26  ;;  %v319_v47 = vmul.f32 %v1381_v38, %v311_v52  ;;  %v349_v57 = vadd.f32 %v348_v54, %v347_v42  ;;  %v354_v58 = vrot.slane %v353_v30, 1  ;;  %v496_v38 = vld [vmem:[%s2110_s4 + $0x38] sm:$0xff]  ;;  %512 = vmatpush.msra.mxu1 %v497_v41  ;;  %v368_v3 = vld [vmem:[%s2112_s2] sm:$0xff] }
  0x55   :  { %v359_v50 = vadd.f32 %v358_v31, %v357_v46  ;;  %v401_v45 = vunpack.c.l.b16 %v385_v49  ;;  %v402_v55 = vunpack.c.l.b16 %v386_v8  ;;  %v403_v36 = vunpack.c.l.b16 %v387_v32  ;;  %534 = vmatpush.msra.mxu2 %v497_v41  ;;  %v1185_v46 = vld [vmem:[%s2113_s5 + $0xa8] sm:$0xf]  ;;  %v1187_v26 = vld [vmem:[%s2113_s5 + $0xb4] sm:$0xf0]  ;;  %v1325_v52 = vld [vmem:[%s2113_s5 + $0xb8] sm:$0xf0] }
  0x56   :  { %v404_v25 = vunpack.c.l.b16 %v388_v35  ;;  %v355_v60 = vadd.f32 %v354_v58, %v353_v30  ;;  %v362_v9 = vrot.slane %v319_v47, 4  ;;  %v389_v62 = vpack.c.bf16 %v349_v57, %v349_v57  ;;  %513 = vmatpush.msra.mxu1 %v496_v38  ;;  %v1173_v32 = vld [vmem:[%s2113_s5 + $0x90] sm:$0xf]  ;;  %v1321_v35 = vld [vmem:[%s2113_s5 + $0x98] sm:$0xf0] }
  0x57   :  { %v360_v28 = vrot.slane %v359_v50, 1  ;;  %v410_v19 = vsel %vm409_vm15, %v402_v55, %v401_v45  ;;  %vm411_vm1 = vcmask 1042434   ;;  %vm413_vm4 = vcmask 1043459   ;;  %535 = vmatpush.msra.mxu2 %v496_v38  ;;  %v1175_v57 = vld [vmem:[%s2113_s5 + $0x9c] sm:$0xf0] }
  0x58   :  { %v363_v2 = vadd.f32 %v362_v9, %v319_v47  ;;  %v390_v12 = vpack.c.bf16 %v355_v60, %v355_v60  ;;  %v405_v6 = vunpack.c.l.b16 %v389_v62  ;;  %v412_v7 = vsel %vm411_vm1, %v403_v36, %v410_v19  ;;  %514 = vmatpush.msra.mxu1 %v495_v15  ;;  %v1181_v58 = vld [vmem:[%s2113_s5 + $0x98] sm:$0xf]  ;;  %v1317_v41 = vld [vmem:[%s2113_s5 + $0x7c] sm:$0xf]  ;;  %v1169_v9 = vld [vmem:[%s2113_s5 + $0x80] sm:$0xf] }
  0x59   :  { %v361_v1 = vadd.f32 %v360_v28, %v359_v50  ;;  %v414_v59 = vsel %vm413_vm4, %v404_v25, %v412_v7  ;;  %vm415_vm9 = vcmask 1044484   ;;  %vm417_vm2 = vcmask 1045509   ;;  %536 = vmatpush.msra.mxu2 %v495_v15  ;;  %v1322_v50 = vld [vmem:[%s2113_s5 + $0xa0] sm:$0xf0]  ;;  %v1161_v36 = vld [vmem:[%s2113_s5 + $0x78] sm:$0xf] }
  0x5a   :  { %v364_v34 = vrot.slane %v363_v2, 2  ;;  %v406_v21 = vunpack.c.l.b16 %v390_v12  ;;  %v416_v56 = vsel %vm415_vm9, %v405_v6, %v414_v59  ;;  %515 = vmatpush.msra.mxu1 %v494_v17  ;;  %vm419_vm3 = vcmask 1046534   ;;  %v1318_v25 = vld [vmem:[%s2113_s5 + $0x80] sm:$0xf0]  ;;  %v1163_v28 = vld [vmem:[%s2113_s5 + $0x84] sm:$0xf0] }
  0x5b   :  { %v391_v16 = vpack.c.bf16 %v361_v1, %v361_v1  ;;  %537 = vmatpush.msra.mxu2 %v494_v17  ;;  %vm421_vm6 = vcmask 1047559   ;;  %v487_v24 = vperm.slane %v1858_v53, 0  ;;  %v1186_v23 = vor.u32 %v1324_v33, %v1185_v46  ;;  %v1319_v62 = vld [vmem:[%s2113_s5 + $0x88] sm:$0xf0]  ;;  %v1149_v1 = vld [vmem:[%s2113_s5 + $0x60] sm:$0xf] }
  0x5c   :  { %v365_v20 = vadd.f32 %v364_v34, %v363_v2  ;;  %v418_v63 = vsel %vm417_vm2, %v406_v21, %v416_v56  ;;  %516 = vmatpush.msra.mxu1 %v493_v61  ;;  %v1190_v54 = vor.u32 %v1323_v48, %v1187_v26  ;;  %v1194_v30 = vor.u32 %v1325_v52, %v1193_v51  ;;  %v1315_v2 = vld [vmem:[%s2113_s5 + $0x68] sm:$0xf0]  ;;  %v1314_v12 = vld [vmem:[%s2113_s5 + $0x64] sm:$0xf]  ;;  %v1151_v7 = vld [vmem:[%s2113_s5 + $0x6c] sm:$0xf0] }
  0x5d   :  { %v407_v10 = vunpack.c.l.b16 %v391_v16  ;;  %538 = vmatpush.msra.mxu2 %v493_v61  ;;  %726 = vmatpush.bf16.msra.mxu3 %v1186_v23  ;;  %v1174_v47 = vor.u32 %v1321_v35, %v1173_v32  ;;  %v1178_v45 = vor.u32 %v1320_v22, %v1175_v57  ;;  %v1182_v55 = vor.u32 %v1322_v50, %v1181_v58  ;;  %v1157_v15 = vld [vmem:[%s2113_s5 + $0x68] sm:$0xf]  ;;  %v1316_v34 = vld [vmem:[%s2113_s5 + $0x70] sm:$0xf0]  ;;  %v1311_v21 = vld [vmem:[%s2113_s5 + $0x4c] sm:$0xf] }
  0x5e   :  { %v366_v5 = vrot.slane %v365_v20, 1  ;;  %517 = vmatpush.msra.mxu1 %v492_v40  ;;  %739 = vmatpush.bf16.msrb.mxu0 %v1190_v54  ;;  %v1162_v60 = vor.u32 %v1318_v25, %v1161_v36  ;;  %v1166_v19 = vor.u32 %v1317_v41, %v1163_v28  ;;  %v1170_v38 = vor.u32 %v1319_v62, %v1169_v9  ;;  %v1137_v17 = vld [vmem:[%s2113_s5 + $0x48] sm:$0xf]  ;;  %v1139_v61 = vld [vmem:[%s2113_s5 + $0x54] sm:$0xf0] }
  0x5f   :  { %v420_v18 = vsel %vm419_vm3, %v407_v10, %v418_v63  ;;  %539 = vmatpush.msra.mxu2 %v492_v40  ;;  %v1150_v6 = vor.u32 %v1315_v2, %v1149_v1  ;;  %v1154_v59 = vor.u32 %v1314_v12, %v1151_v7  ;;  %v1158_v16 = vor.u32 %v1316_v34, %v1157_v15  ;;  %v1313_v10 = vld [vmem:[%s2113_s5 + $0x58] sm:$0xf0]  ;;  %v1125_v63 = vld [vmem:[%s2113_s5 + $0x30] sm:$0xf]  ;;  %v1121_v46 = vld [vmem:[%s2113_s5 + $0x20] sm:$0xf] }
  0x60   :  { %v367_v11 = vadd.f32 %v366_v5, %v365_v20  ;;  %518 = vmatpush.msra.mxu1 %v491_v37  ;;  %v1312_v20 = vld [vmem:[%s2113_s5 + $0x50] sm:$0xf0]  ;;  %v1145_v5 = vld [vmem:[%s2113_s5 + $0x50] sm:$0xf]  ;;  %v1142_v40 = vor.u32 %v1311_v21, %v1139_v61  ;;  %v1307_v33 = vld [vmem:[%s2113_s5 + $0x28] sm:$0xf0] }
  0x61   :  { %540 = vmatpush.msra.mxu2 %v491_v37  ;;  %727 = vmatpush.bf16.msra.mxu3 %v1174_v47  ;;  %v1138_v56 = vor.u32 %v1312_v20, %v1137_v17  ;;  %v1310_v37 = vld [vmem:[%s2113_s5 + $0x40] sm:$0xf0]  ;;  %v1122_v23 = vor.u32 %v1307_v33, %v1121_v46  ;;  %v1101_v26 = vld [vmem:[%s2113_s5] sm:$0xf]  ;;  %v1303_v51 = vld [vmem:[%s2113_s5 + $0x8] sm:$0xf0] }
  0x62   :  { %v392_v0 = vpack.c.bf16 %v367_v11, %v367_v11  ;;  %519 = vmatpush.msra.mxu1 %v490_v39  ;;  %740 = vmatpush.bf16.msrb.mxu0 %v1178_v45  ;;  %v1146_v11 = vor.u32 %v1313_v10, %v1145_v5  ;;  %v1302_v52 = vld [vmem:[%s2113_s5 + $0x4] sm:$0xf]  ;;  %v1102_v54 = vor.u32 %v1303_v51, %v1101_v26  ;;  %v558_v25 = vperm.slane %v1858_v53, 1  ;;  %v1349_v1 = vld [vmem:[%s2114_s6 + $0xb8] sm:$0xff]  ;;  %v1348_v2 = vld [vmem:[%s2114_s6 + $0xb0] sm:$0xff] }
  0x63   :  { %541 = vmatpush.msra.mxu2 %v490_v39  ;;  %v560_v28 = vperm.slane %v1858_v53, 2  ;;  %v1333_v12 = vld [vmem:[%s2114_s6 + $0x38] sm:$0xff]  ;;  %v1347_v7 = vld [vmem:[%s2114_s6 + $0xa8] sm:$0xff]  ;;  %v1332_v15 = vld [vmem:[%s2114_s6 + $0x30] sm:$0xff] }
  0x64   :  { %v408_v14 = vunpack.c.l.b16 %v392_v0  ;;  %520 = vmatpush.msra.mxu1 %v489_v13  ;;  %v1309_v0 = vld [vmem:[%s2113_s5 + $0x38] sm:$0xf0]  ;;  %v1338_v34 = vld [vmem:[%s2114_s6 + $0x60] sm:$0xff]  ;;  %v1344_v61 = vld [vmem:[%s2114_s6 + $0x90] sm:$0xff] }
  0x65   :  { %542 = vmatpush.msra.mxu2 %v489_v13  ;;  %728 = vmatpush.bf16.msra.mxu3 %v1162_v60  ;;  %v1337_v17 = vld [vmem:[%s2114_s6 + $0x58] sm:$0xff]  ;;  %v1330_v21 = vld [vmem:[%s2114_s6 + $0x20] sm:$0xff]  ;;  %v62_v10 = vld [vmem:[%s2111_s7 + $0x8] sm:$0xff] }
  0x66   :  { %v422_v29 = vsel %vm421_vm6, %v408_v14, %v420_v18  ;;  %752 = vmatpush.bf16.msrb.mxu1 %v1194_v30  ;;  %741 = vmatpush.bf16.msrb.mxu0 %v1166_v19  ;;  %v1308_v18 = vld [vmem:[%s2113_s5 + $0x34] sm:$0xf]  ;;  %v1126_v14 = vor.u32 %v1309_v0, %v1125_v63  ;;  %v1103_v30 = vld [vmem:[%s2113_s5 + $0xc] sm:$0xf0]  ;;  %v1345_v20 = vld [vmem:[%s2114_s6 + $0x98] sm:$0xff]  ;;  %v596_v0 = vperm.slane %v62_v10, 3 }
  0x67   :  { %v423_v43 = vpack.c.b16 %v422_v29, %v422_v29  ;;  %v1127_v29 = vld [vmem:[%s2113_s5 + $0x3c] sm:$0xf0]  ;;  %v1106_v32 = vor.u32 %v1302_v52, %v1103_v30  ;;  %1020 = vmatpush.bf16.msrb.mxu2 %v1333_v12  ;;  %v1329_v5 = vld [vmem:[%s2114_s6 + $0x18] sm:$0xff]  ;;  %v1343_v63 = vld [vmem:[%s2114_s6 + $0x88] sm:$0xff] }
  0x68   :  { %v1130_v39 = vor.u32 %v1308_v18, %v1127_v29  ;;  %v1328_v18 = vld [vmem:[%s2114_s6 + $0x10] sm:$0xff]  ;;  %v1334_v29 = vld [vmem:[%s2114_s6 + $0x40] sm:$0xff] }
  0x69   :  { %481 = vmatmul.bf16.vlgmr.msra.gmra.mxu0 %v423_v43  ;;  %729 = vmatpush.bf16.msra.mxu3 %v1150_v6  ;;  %v1133_v43 = vld [vmem:[%s2113_s5 + $0x38] sm:$0xf]  ;;  %v1339_v6 = vld [vmem:[%s2114_s6 + $0x68] sm:$0xff]  ;;  %v1326_v46 = vld [vmem:[%s2114_s6] sm:$0xff] }
  0x6a   :  { %753 = vmatpush.bf16.msrb.mxu1 %v1182_v55  ;;  %742 = vmatpush.bf16.msrb.mxu0 %v1154_v59  ;;  %v1134_v13 = vor.u32 %v1310_v37, %v1133_v43  ;;  %v1346_v59 = vld [vmem:[%s2114_s6 + $0xa0] sm:$0xff] }
  0x6b   :  { %1021 = vmatpush.bf16.msrb.mxu2 %v1332_v15  ;;  %v1342_v43 = vld [vmem:[%s2114_s6 + $0x80] sm:$0xff] }
  0x6d   :  { %730 = vmatpush.bf16.msra.mxu3 %v1138_v56  ;;  %v1336_v56 = vld [vmem:[%s2114_s6 + $0x50] sm:$0xff] }
  0x6e   :  { %754 = vmatpush.bf16.msrb.mxu1 %v1170_v38  ;;  %743 = vmatpush.bf16.msrb.mxu0 %v1142_v40  ;;  %v1341_v38 = vld [vmem:[%s2114_s6 + $0x78] sm:$0xff]  ;;  %v63_v40 = vld [vmem:[%s2111_s7 + $0x10] sm:$0xff] }
  0x71   :  { %731 = vmatpush.bf16.msra.mxu3 %v1126_v14  ;;  %v597_v14 = vperm.slane %v63_v40, 3 }
  0x72   :  { %755 = vmatpush.bf16.msrb.mxu1 %v1158_v16  ;;  %744 = vmatpush.bf16.msrb.mxu0 %v1130_v39  ;;  %v1331_v16 = vld [vmem:[%s2114_s6 + $0x28] sm:$0xff] }
  0x73   :  { %1022 = vmatpush.bf16.msrb.mxu2 %v1331_v16 }
  0x76   :  { %756 = vmatpush.bf16.msrb.mxu1 %v1146_v11  ;;  %v1335_v11 = vld [vmem:[%s2114_s6 + $0x48] sm:$0xff] }
  0x77   :  { %1023 = vmatpush.bf16.msrb.mxu2 %v1330_v21 }
  0x7a   :  { %757 = vmatpush.bf16.msrb.mxu1 %v1134_v13 }
  0x7b   :  { %1024 = vmatpush.bf16.msrb.mxu2 %v1329_v5 }
  0x7e   :  { %758 = vmatpush.bf16.msrb.mxu1 %v1122_v23 }
  0x7f   :  { %1025 = vmatpush.bf16.msrb.mxu2 %v1328_v18 }
  0xe6   :  { %v482_v27 = vpop.f32.mrf.mxu0 }
  0xe7   :  { %v486_v44 = vadd.f32 %v482_v27, %v368_v3  ;;  %v1113_v3 = vld [vmem:[%s2113_s5 + $0x18] sm:$0xf]  ;;  %v1305_v27 = vld [vmem:[%s2113_s5 + $0x1c] sm:$0xf] }
  0xe9   :  { %v1864_v4 = vadd.f32 %v487_v24, %v486_v44  ;;  %v1306_v24 = vld [vmem:[%s2113_s5 + $0x20] sm:$0xf0] }
  0xea   :  { %v1114_v44 = vor.u32 %v1306_v24, %v1113_v3  ;;  %v1327_v3 = vld [vmem:[%s2114_s6 + $0x8] sm:$0xff] }
  0xeb   :  { %521 = vmatmul.f32.vlgmr.msra.gmra.mxu1 %v1864_v4  ;;  %1026 = vmatpush.bf16.msrb.mxu2 %v1327_v3 }
  0xec   :  { %732 = vmatpush.bf16.msra.mxu3 %v1114_v44  ;;  %v595_v44 = vperm.slane %v1858_v53, 3 }
  0xee   :  { %v484_v42 = vpop.f32.mrf.mxu0 }
  0xef   :  { %v1115_v42 = vld [vmem:[%s2113_s5 + $0x24] sm:$0xf0]  ;;  %1027 = vmatpush.bf16.msrb.mxu2 %v1326_v46 }
  0xf0   :  { %v1118_v48 = vor.u32 %v1305_v27, %v1115_v42  ;;  %733 = vmatpush.bf16.msra.mxu3 %v1102_v54 }
  0xf2   :  { %745 = vmatpush.bf16.msrb.mxu0 %v1118_v48 }
  0xf4   :  { %1033 = vmatpush.bf16.msrb.mxu3 %v1341_v38 }
  0xf6   :  { %746 = vmatpush.bf16.msrb.mxu0 %v1106_v32 }
  0xfa   :  { %1046 = vmatpush.bf16.msra.mxu0 %v1349_v1 }
  0xfe   :  { %1047 = vmatpush.bf16.msra.mxu0 %v1348_v2 }
 0x102   :  { %1048 = vmatpush.bf16.msra.mxu0 %v1347_v7 }
 0x106   :  { %1049 = vmatpush.bf16.msra.mxu0 %v1346_v59 }
 0x10a   :  { %1050 = vmatpush.bf16.msra.mxu0 %v1345_v20 }
 0x10e   :  { %1051 = vmatpush.bf16.msra.mxu0 %v1344_v61 }
 0x112   :  { %1052 = vmatpush.bf16.msra.mxu0 %v1343_v63 }
 0x116   :  { %1053 = vmatpush.bf16.msra.mxu0 %v1342_v43 }
 0x168   :  { %v522_v31 = vpop.f32.mrf.mxu1 }
 0x169   :  { %v1886_v49 = vsub.f32 %v1864_v4, %v522_v31  ;;  %v1109_v31 = vld [vmem:[%s2113_s5 + $0x8] sm:$0xf] }
 0x16b   :  { %v526_v8 = vmul.f32 %v1886_v49, %v1886_v49 }
 0x16d   :  { %543 = vmatmul.f32.vlgmr.msra.gmra.mxu2 %v526_v8  ;;  %v1304_v8 = vld [vmem:[%s2113_s5 + $0x10] sm:$0xf0] }
 0x16e   :  { %v1110_v35 = vor.u32 %v1304_v8, %v1109_v31 }
 0x170   :  { %759 = vmatpush.bf16.msrb.mxu1 %v1110_v35 }
 0x1f0   :  { %v544_v22 = vpop.f32.mrf.mxu2 }
 0x1f1   :  { %v545_v47 = vadd.f32 1e-05, %v544_v22 }
 0x1f3   :  { %1420 = vrsqrt.f32 %v545_v47  ;;  %vm553_vm7 = vweird.f32 %v545_v47 }
 0x1f9   :  { %v1421_v57 = vpop.eup %1420 }
 0x1fa   :  { %v548_v58 = vmul.f32 %v1421_v57, %v545_v47  ;;  %vm554_vm5 = vweird.f32 %v1421_v57 }
 0x1fb   :  { %vm555_vm8 = vmor %vm553_vm7, %vm554_vm5 }
 0x1fc   :  { %v549_v50 = vmul.f32 %v1421_v57, %v548_v58 }
 0x1fe   :  { %v550_v45 = vmul.f32 0.5, %v549_v50 }
 0x200   :  { %v551_v55 = vsub.f32 1.5, %v550_v45 }
 0x202   :  { %v552_v36 = vmul.f32 %v1421_v57, %v551_v55 }
 0x204   :  { %v556_v41 = vsel %vm555_vm8, %v1421_v57, %v552_v36 }
 0x205   :  { %v557_v60 = vmul.f32 %v556_v41, %v1886_v49  ;;  %v1340_v49 = vld [vmem:[%s2114_s6 + $0x70] sm:$0xff] }
 0x206   :  { %1034 = vmatpush.bf16.msrb.mxu3 %v1340_v49 }
 0x207   :  { %v559_v9 = vmul.f32 %v558_v25, %v557_v60 }
 0x209   :  { %v561_v62 = vadd.f32 %v560_v28, %v559_v9 }
 0x20a   :  { %1035 = vmatpush.bf16.msrb.mxu3 %v1339_v6 }
 0x20b   :  { %v594_v19 = vpack.c.bf16 %v561_v62, %v561_v62 }
 0x20d   :  { %734 = vmatmul.bf16.vlgmr.msra.gmra.mxu3 %v594_v19  ;;  %747 = vmatmul.bf16.vlgmr.msrb.gmra.mxu0 %v594_v19 }
 0x20e   :  { %760 = vmatmul.bf16.vlgmr.msrb.gmra.mxu1 %v594_v19  ;;  %1036 = vmatpush.bf16.msrb.mxu3 %v1338_v34 }
 0x212   :  { %1037 = vmatpush.bf16.msrb.mxu3 %v1337_v17 }
 0x216   :  { %1038 = vmatpush.bf16.msrb.mxu3 %v1336_v56 }
 0x21a   :  { %1039 = vmatpush.bf16.msrb.mxu3 %v1335_v11 }
 0x21e   :  { %1040 = vmatpush.bf16.msrb.mxu3 %v1334_v29 }
 0x28a   :  { %v748_v37 = vpop.f32.mrf.mxu0 }
 0x28b   :  { %v749_v39 = vadd.f32 %v748_v37, %v596_v0  ;;  %v761_v13 = vpop.f32.mrf.mxu1 }
 0x28c   :  { %v762_v24 = vadd.f32 %v761_v13, %v597_v14  ;;  %v1060_v13 = vperm.slane %v1858_v53, 4 }
 0x28d   :  { %v1196_v27 = vmul.f32 -1.442695, %v749_v39 }
 0x28e   :  { %v1197_v42 = vmul.f32 -1.442695, %v762_v24 }
 0x28f   :  { %1422 = vpow2.f32 %v1196_v27 }
 0x290   :  { %1424 = vpow2.f32 %v1197_v42  ;;  %v735_v33 = vpop.f32.mrf.mxu3 }
 0x291   :  { %v2098_v48 = vadd.f32 %v735_v33, %v595_v44 }
 0x292   :  { %v750_v23 = vpop.f32.mrf.mxu0 }
 0x293   :  { %v1195_v26 = vmul.f32 -1.442695, %v2098_v48  ;;  %v763_v51 = vpop.f32.mrf.mxu1 }
 0x295   :  { %v1423_v52 = vpop.eup %1422  ;;  %1426 = vpow2.f32 %v1195_v26 }
 0x296   :  { %v1425_v54 = vpop.eup %1424  ;;  %v775_v30 = vadd.f32 1.0, %v1423_v52 }
 0x297   :  { %v776_v31 = vadd.f32 1.0, %v1425_v54 }
 0x298   :  { %1428 = vrcp.f32 %v775_v30  ;;  %v737_v8 = vpop.f32.mrf.mxu3  ;;  %v801_v45 = vand.u32 2147483647, %v775_v30  ;;  %v803_v55 = vand.u32 2147483648, %v775_v30  ;;  %vm797_vm12 = vweird.f32 %v775_v30 }
 0x299   :  { %1430 = vrcp.f32 %v776_v31  ;;  %v816_v41 = vand.u32 2147483647, %v776_v31  ;;  %v818_v60 = vand.u32 2147483648, %v776_v31  ;;  %vm812_vm15 = vweird.f32 %v776_v31 }
 0x29a   :  { %vm802_vm14 = vcmp.eq.f32.partialorder %v801_v45, 8.507059e+37  ;;  %v804_v38 = vor.u32 1.1754944e-38, %v803_v55 }
 0x29b   :  { %v1427_v32 = vpop.eup %1426  ;;  %vm817_vm1 = vcmp.eq.f32.partialorder %v816_v41, 8.507059e+37  ;;  %v819_v2 = vor.u32 1.1754944e-38, %v818_v60 }
 0x29c   :  { %v774_v35 = vadd.f32 1.0, %v1427_v32 }
 0x29e   :  { %v1429_v22 = vpop.eup %1428  ;;  %1432 = vrcp.f32 %v774_v35  ;;  %v786_v15 = vand.u32 2147483647, %v774_v35  ;;  %v788_v34 = vand.u32 2147483648, %v774_v35  ;;  %vm782_vm9 = vweird.f32 %v774_v35 }
 0x29f   :  { %v1431_v47 = vpop.eup %1430  ;;  %v793_v57 = vmul.f32 %v1429_v22, %v775_v30  ;;  %vm798_vm10 = vweird.f32 %v1429_v22 }
 0x2a0   :  { %v808_v58 = vmul.f32 %v1431_v47, %v776_v31  ;;  %vm813_vm11 = vweird.f32 %v1431_v47  ;;  %vm799_vm13 = vmor %vm797_vm12, %vm798_vm10  ;;  %v789_v5 = vor.u32 1.1754944e-38, %v788_v34  ;;  %vm787_vm3 = vcmp.eq.f32.partialorder %v786_v15, 8.507059e+37 }
 0x2a1   :  { %v794_v50 = vsub.f32 1.0, %v793_v57  ;;  %vm814_vm0 = vmor %vm812_vm15, %vm813_vm11 }
 0x2a2   :  { %v809_v36 = vsub.f32 1.0, %v808_v58 }
 0x2a3   :  { %v795_v25 = vmul.f32 %v1429_v22, %v794_v50 }
 0x2a4   :  { %v1433_v28 = vpop.eup %1432  ;;  %v810_v9 = vmul.f32 %v1431_v47, %v809_v36 }
 0x2a5   :  { %v796_v62 = vadd.f32 %v1429_v22, %v795_v25  ;;  %v778_v19 = vmul.f32 %v1433_v28, %v774_v35  ;;  %vm783_vm4 = vweird.f32 %v1433_v28 }
 0x2a6   :  { %v811_v1 = vadd.f32 %v1431_v47, %v810_v9  ;;  %vm784_vm2 = vmor %vm782_vm9, %vm783_vm4 }
 0x2a7   :  { %v800_v49 = vsel %vm799_vm13, %v1429_v22, %v796_v62  ;;  %v779_v12 = vsub.f32 1.0, %v778_v19 }
 0x2a8   :  { %v805_v6 = vsel %vm802_vm14, %v804_v38, %v800_v49  ;;  %v815_v7 = vsel %vm814_vm0, %v1431_v47, %v811_v1 }
 0x2a9   :  { %v823_v59 = vmul.f32 %v805_v6, %v749_v39  ;;  %v820_v16 = vsel %vm817_vm1, %v819_v2, %v815_v7  ;;  %v780_v17 = vmul.f32 %v1433_v28, %v779_v12 }
 0x2aa   :  { %v824_v20 = vmul.f32 %v820_v16, %v762_v24 }
 0x2ab   :  { %v874_v21 = vpack.c.bf16 %v823_v59, %v823_v59  ;;  %v781_v56 = vadd.f32 %v1433_v28, %v780_v17 }
 0x2ac   :  { %v875_v61 = vpack.c.bf16 %v824_v20, %v824_v20 }
 0x2ad   :  { %v785_v10 = vsel %vm784_vm2, %v1433_v28, %v781_v56  ;;  %1041 = vmatmul.bf16.vlgmr.msrb.gmra.mxu3 %v874_v21 }
 0x2ae   :  { %v790_v40 = vsel %vm787_vm3, %v789_v5, %v785_v10  ;;  %1054 = vmatmul.bf16.vlgmr.msra.gmra.mxu0 %v875_v61 }
 0x2af   :  { %v822_v11 = vmul.f32 %v790_v40, %v2098_v48 }
 0x2b1   :  { %v873_v63 = vpack.c.bf16 %v822_v11, %v822_v11 }
 0x2b3   :  { %1028 = vmatmul.bf16.vlgmr.msrb.gmra.mxu2 %v873_v63 }
 0x32b   :  { %v1055_v0 = vpop.f32.mrf.mxu0 }
 0x330   :  { %v1042_v18 = vpop.f32.mrf.mxu3 }
 0x333   :  { %v1057_v14 = vpop.f32.mrf.mxu0 }
 0x336   :  { %v1029_v29 = vpop.f32.mrf.mxu2 }
 0x337   :  { %v1043_v43 = vadd.f32 %v1042_v18, %v1029_v29 }
 0x338   :  { %v1044_v37 = vpop.f32.mrf.mxu3 }
 0x339   :  { %v1056_v39 = vadd.f32 %v1055_v0, %v1043_v43 }
 0x33b   :  { %v1059_v3 = vadd.f32 %v1056_v39, %v1864_v4 }
 0x33d   :  { %v1061_v24 = vadd.f32 %v1060_v13, %v1059_v3 }
 0x33e   :  { %v1031_v27 = vpop.f32.mrf.mxu2 }
 0x33f   :  { %1062 = vst [vmem:[%s2115_s8] sm:$0xff] %v1061_v24 }

</bundles_post_ra>
